<compile_context>
chip_gen: v7x
topology: tpu7x:2x2x1
jax: 0.10.0
libtpu: 0.0.40
codegen_flags: <defaults>
</compile_context>

<pallas_src>
import functools

import jax
import jax.numpy as jnp
from jax import lax
from jax.experimental import pallas as pl
from jax.experimental.pallas import tpu as pltpu


# --------------------------------------------------------------------------- #
# Kernels
# --------------------------------------------------------------------------- #
def _layer1_fused_kernel(adj_ref, s1_ref, b1_ref, w2_ref, out_ref):
    # h_tile   = relu(adj_tile @ support1 + b1)   (fp32 epilogue)
    # out_tile = h_tile @ W2_padded               (bf16 operands, fp32 acc)
    adj_t = adj_ref[...].astype(jnp.bfloat16)  # per-tile cast; no-op if cached bf16
    acc = jnp.dot(adj_t, s1_ref[...], preferred_element_type=jnp.float32)
    h = jnp.maximum(acc + b1_ref[...], 0.0)
    # Dropout is identity in eval mode.
    # TODO(synk): training-mode dropout via pltpu.prng_seed / prng_random_bits.
    out_ref[...] = jnp.dot(
        h.astype(jnp.bfloat16), w2_ref[...], preferred_element_type=jnp.float32
    ).astype(out_ref.dtype)


def _layer2_logsoftmax_kernel(adj_ref, s2_ref, b2_ref, out_ref, *, nclass):
    # z_tile = adj_tile @ support2 + b2 ; numerically-stable log_softmax over
    # the first `nclass` (real) columns; padded lanes are sliced in the wrapper.
    adj_t = adj_ref[...].astype(jnp.bfloat16)
    z = jnp.dot(adj_t, s2_ref[...], preferred_element_type=jnp.float32)
    z = z + b2_ref[...]
    col = lax.broadcasted_iota(jnp.int32, z.shape, dimension=1)
    valid = col < nclass
    m = jnp.max(jnp.where(valid, z, jnp.float32(-jnp.inf)), axis=1, keepdims=True)
    shifted = z - m
    sumexp = jnp.sum(jnp.where(valid, jnp.exp(shifted), 0.0), axis=1, keepdims=True)
    out_ref[...] = (shifted - jnp.log(sumexp)).astype(out_ref.dtype)


# --------------------------------------------------------------------------- #
# Tiling / budget helpers
# --------------------------------------------------------------------------- #
def _round_up(v, m):
    return ((v + m - 1) // m) * m


def _vmem_budget_bytes():
    """Generation-aware scoped-VMEM budget (leave headroom vs physical)."""
    try:
        cap = pltpu.get_tpu_info().vmem_capacity_bytes
    except Exception:
        cap = 64 << 20  # conservative (v7x-sized) fallback
    # v5e/v6e (128 MiB) -> 112 MiB ; v7x (64 MiB) -> 48 MiB.
    return int(max(min(cap - (16 << 20), 112 << 20), 32 << 20))


def _choose_row_tile(n, nhid, cp, adj_itemsize, vmem_budget, num_cores=2):
    """Row tile for the adj-streaming kernels: pipeline- and VMEM-aware."""
    if n <= 256:
        return n  # tiny graph: single full tile
    # Resident (fetched-once, single-buffered) operands per heavy kernel.
    resident = n * max(nhid, cp) * 2 + nhid * cp * 2 + 4 * (nhid + cp)
    avail = vmem_budget - resident - (4 << 20)  # slack for compiler scratch
    per_row = (2 * n * adj_itemsize   # double-buffered adj stripe
               + 2 * cp * 4           # double-buffered output tile (fp32 worst case)
               + cp * 4)              # fp32 intermediates
    tm_vmem = max(8, avail // per_row) if avail > 0 else 8
    # Pipeline depth: >= 4 grid steps per TensorCore so DMA overlaps compute.
    tm_pipe = max(8, n // (4 * num_cores))
    tm = int(min(512, tm_vmem, tm_pipe))
    tm = max(8, (tm // 8) * 8)
    # Snap to MXU-friendly multiples of 128 when possible.
    for cand in (512, 384, 256, 128):
        if cand <= tm:
            return cand
    return tm


def _resident_spec(shape):
    """Grid-invariant operand: fetched once; request a single VMEM buffer."""
    try:
        return pl.BlockSpec(shape, lambda i: (0, 0), pipeline_mode=pl.Buffered(1))
    except Exception:  # older Pallas without pipeline_mode / Buffered
        return pl.BlockSpec(shape, lambda i: (0, 0))


# --------------------------------------------------------------------------- #
# Wrapper
# --------------------------------------------------------------------------- #
def gcn_forward(x, adj, w1, b1, w2, b2, *, tm=None):
    """Eval-mode GCN forward.  `adj` may be fp32 or (preferably, if the graph
    is static across calls) pre-cast bf16; kernels cast per-tile either way."""
    n, nfeat = x.shape
    nhid = w1.shape[1]
    nclass = w2.shape[1]
    cp = _round_up(max(nclass, 128), 128)  # lane-dense padded class axis

    bf16 = jnp.bfloat16
    w1b = w1.astype(bf16)
    w2p = jnp.zeros((nhid, cp), bf16).at[:, :nclass].set(w2.astype(bf16))
    b1f = b1.reshape(1, nhid).astype(jnp.float32)
    b2p = jnp.zeros((1, cp), jnp.float32).at[:, :nclass].set(
        b2.reshape(1, nclass).astype(jnp.float32))

    vmem_budget = _vmem_budget_bytes()
    if tm is None:
        tm = _choose_row_tile(n, nhid, cp, adj.dtype.itemsize, vmem_budget)
    grid = (pl.cdiv(n, tm),)

    cparams = pltpu.CompilerParams(
        dimension_semantics=("parallel",),   # megacore row split on v7x
        vmem_limit_bytes=vmem_budget,
    )

    # ---- support1 = x @ W1: tiny memory-bound matmul, nothing to fuse ->
    #      plain XLA dot (no separate pallas_call / HBM-side launch overhead).
    support1 = jnp.dot(x.astype(bf16), w1b,
                       preferred_element_type=jnp.float32).astype(bf16)

    # ---- Kernel A: support2 = relu(adj @ support1 + b1) @ W2_pad ----
    support2 = pl.pallas_call(
        _layer1_fused_kernel,
        out_shape=jax.ShapeDtypeStruct((n, cp), bf16),
        grid=grid,
        in_specs=[
            pl.BlockSpec((tm, n), lambda i: (i, 0)),  # adj row stripe (streamed)
            _resident_spec((n, nhid)),                # support1 (resident)
            _resident_spec((1, nhid)),                # b1
            _resident_spec((nhid, cp)),               # W2 padded
        ],
        out_specs=pl.BlockSpec((tm, cp), lambda i: (i, 0)),
        compiler_params=cparams,
        cost_estimate=pl.CostEstimate(
            flops=2 * n * n * nhid + 2 * n * nhid * cp,
            transcendentals=0,
            bytes_accessed=adj.dtype.itemsize * n * n
            + 2 * (n * nhid + nhid * cp + n * cp) + 4 * nhid,
        ),
    )(adj, support1, b1f, w2p)

    # ---- Kernel B: out = masked log_softmax(adj @ support2 + b2) ----
    out_padded = pl.pallas_call(
        functools.partial(_layer2_logsoftmax_kernel, nclass=nclass),
        out_shape=jax.ShapeDtypeStruct((n, cp), jnp.float32),
        grid=grid,
        in_specs=[
            pl.BlockSpec((tm, n), lambda i: (i, 0)),  # adj row stripe (streamed)
            _resident_spec((n, cp)),                  # support2 (resident)
            _resident_spec((1, cp)),                  # b2 padded
        ],
        out_specs=pl.BlockSpec((tm, cp), lambda i: (i, 0)),
        compiler_params=cparams,
        cost_estimate=pl.CostEstimate(
            flops=2 * n * n * cp,
            transcendentals=n * cp,
            bytes_accessed=adj.dtype.itemsize * n * n
            + 2 * n * cp + 4 * (cp + n * cp),
        ),
    )(adj, support2, b2p)

    return out_padded[:, :nclass]


# --------------------------------------------------------------------------- #
# Parameter init (mirrors GraphConvolution.reset_parameters) and reference
# --------------------------------------------------------------------------- #
def init_params(key, nfeat, nhid, nclass):
    # uniform(-stdv, stdv), stdv = 1/sqrt(out_features)
    k1, k2, k3, k4 = jax.random.split(key, 4)
    stdv1 = 1.0 / jnp.sqrt(jnp.float32(nhid))
    stdv2 = 1.0 / jnp.sqrt(jnp.float32(nclass))
    w1 = jax.random.uniform(k1, (nfeat, nhid), jnp.float32, -stdv1, stdv1)
    b1 = jax.random.uniform(k2, (1, nhid), jnp.float32, -stdv1, stdv1)
    w2 = jax.random.uniform(k3, (nhid, nclass), jnp.float32, -stdv2, stdv2)
    b2 = jax.random.uniform(k4, (1, nclass), jnp.float32, -stdv2, stdv2)
    return w1, b1, w2, b2


def reference_forward(x, adj, w1, b1, w2, b2):
    # Mirrors the kernel's bf16-operand / fp32-accumulate numerics exactly.
    bf = lambda t: t.astype(jnp.bfloat16)
    s1 = jnp.dot(bf(x), bf(w1),
                 preferred_element_type=jnp.float32).astype(jnp.bfloat16)
    h = jnp.maximum(
        jnp.dot(bf(adj), s1, preferred_element_type=jnp.float32)
        + b1.reshape(1, -1), 0.0)
    s2 = jnp.dot(h.astype(jnp.bfloat16), bf(w2),
                 preferred_element_type=jnp.float32).astype(jnp.bfloat16)
    z = (jnp.dot(bf(adj), s2, preferred_element_type=jnp.float32)
         + b2.reshape(1, -1))
    return jax.nn.log_softmax(z, axis=1)


if __name__ == "__main__":
    # Small but tiling-exercising shapes: N nodes, nfeat inputs, nhid hidden,
    # nclass classes (padded to 128 lanes internally).
    N, NFEAT, NHID, NCLASS = 1024, 256, 128, 16
    DROPOUT = 0.5  # identity in eval mode

    key = jax.random.PRNGKey(0)
    kx, ka, kp = jax.random.split(key, 3)

    x = jax.random.normal(kx, (N, NFEAT), jnp.float32)

    # Symmetric, row-normalized adjacency with self-loops (dense).
    a = jax.random.uniform(ka, (N, N), jnp.float32)
    a = (a + a.T) * 0.5 + jnp.eye(N, dtype=jnp.float32)
    adj = a / jnp.sum(a, axis=1, keepdims=True)

    # The graph is static across forward calls: cast adj to bf16 ONCE here so
    # each forward pass only streams 2 bytes/elem of adjacency from HBM.
    adj_bf16 = adj.astype(jnp.bfloat16)

    w1, b1, w2, b2 = init_params(kp, NFEAT, NHID, NCLASS)

    fwd = jax.jit(gcn_forward)
    out = fwd(x, adj_bf16, w1, b1, w2, b2)
    out = jax.block_until_ready(out)

    ref = reference_forward(x, adj, w1, b1, w2, b2)  # bf(adj) == adj_bf16 bitwise
    assert out.shape == (N, NCLASS)
    max_err = float(jnp.max(jnp.abs(out - ref)))
    assert jnp.allclose(out, ref, atol=2e-3, rtol=2e-3), f"max abs err {max_err}"

    print("KERNEL_OK")
</pallas_src>

<mosaic_0001>
module attributes {stable_mosaic.version = 11 : i64} {
  func.func @_layer1_fused_kernel(%arg0: i32, %arg1: memref<128x1024xbf16, #tpu.memory_space<vmem>>, %arg2: memref<1024x128xbf16, #tpu.memory_space<vmem>>, %arg3: memref<1x128xf32, #tpu.memory_space<vmem>>, %arg4: memref<128x128xbf16, #tpu.memory_space<vmem>>, %arg5: memref<128x128xbf16, #tpu.memory_space<vmem>>) attributes {dimension_semantics = [#tpu.dimension_semantics<parallel>], iteration_bounds = array<i64: 8>, scalar_prefetch = 0 : i64, scratch_operands = 0 : i64, tpu.core_type = #tpu.core_type<tc>, window_params = [{transform_indices = @transform_0, window_bounds = array<i64: 128, 1024>}, {pipeline_mode = #tpu.pipeline_mode<synchronous>, transform_indices = @transform_1, window_bounds = array<i64: 1024, 128>}, {pipeline_mode = #tpu.pipeline_mode<synchronous>, transform_indices = @transform_2, window_bounds = array<i64: 1, 128>}, {pipeline_mode = #tpu.pipeline_mode<synchronous>, transform_indices = @transform_3, window_bounds = array<i64: 128, 128>}, {transform_indices = @transform_4, window_bounds = array<i64: 128, 128>}]} {
    %c0 = arith.constant 0 : index
    %c0_0 = arith.constant 0 : index
    %0 = vector.load %arg1[%c0, %c0_0] : memref<128x1024xbf16, #tpu.memory_space<vmem>>, vector<128x1024xbf16>
    %c0_1 = arith.constant 0 : index
    %c0_2 = arith.constant 0 : index
    %1 = vector.load %arg2[%c0_1, %c0_2] : memref<1024x128xbf16, #tpu.memory_space<vmem>>, vector<1024x128xbf16>
    %cst = arith.constant dense<0.000000e+00> : vector<128x128xf32>
    %2 = tpu.matmul %0, %1, %cst {dimension_numbers = #tpu.dot_dimension_numbers<[1], [0], [0], [1], [0, 0, 1, 1], [], []>} : vector<128x1024xbf16>, vector<1024x128xbf16>, vector<128x128xf32> -> vector<128x128xf32>
    %c0_3 = arith.constant 0 : index
    %c0_4 = arith.constant 0 : index
    %3 = vector.load %arg3[%c0_3, %c0_4] : memref<1x128xf32, #tpu.memory_space<vmem>>, vector<1x128xf32>
    %4 = vector.broadcast %3 : vector<1x128xf32> to vector<128x128xf32>
    %5 = arith.addf %2, %4 : vector<128x128xf32>
    %cst_5 = arith.constant 0.000000e+00 : f32
    %6 = vector.broadcast %cst_5 : f32 to vector<128x128xf32>
    %7 = arith.maximumf %5, %6 : vector<128x128xf32>
    %8 = arith.truncf %7 : vector<128x128xf32> to vector<128x128xbf16>
    %c0_6 = arith.constant 0 : index
    %c0_7 = arith.constant 0 : index
    %9 = vector.load %arg4[%c0_6, %c0_7] : memref<128x128xbf16, #tpu.memory_space<vmem>>, vector<128x128xbf16>
    %cst_8 = arith.constant dense<0.000000e+00> : vector<128x128xf32>
    %10 = tpu.matmul %8, %9, %cst_8 {dimension_numbers = #tpu.dot_dimension_numbers<[1], [0], [0], [1], [0, 0, 1, 1], [], []>} : vector<128x128xbf16>, vector<128x128xbf16>, vector<128x128xf32> -> vector<128x128xf32>
    %11 = arith.truncf %10 : vector<128x128xf32> to vector<128x128xbf16>
    %c0_9 = arith.constant 0 : index
    %c0_10 = arith.constant 0 : index
    %12 = vector.load %arg5[%c0_9, %c0_10] : memref<128x128xbf16, #tpu.memory_space<vmem>>, vector<128x128xbf16>
    tpu.vector_store %arg5[%c0_9, %c0_10], %11 {strides = array<i32>} : memref<128x128xbf16, #tpu.memory_space<vmem>>, vector<128x128xbf16>,
    return
  }
  func.func @transform_0(%arg0: i32) -> (i32, i32) {
    %c0_i32 = arith.constant 0 : i32
    %c0_i32_0 = arith.constant 0 : i32
    return %arg0, %c0_i32 : i32, i32
  }
  func.func @transform_1(%arg0: i32) -> (i32, i32) {
    %c0_i32 = arith.constant 0 : i32
    %c0_i32_0 = arith.constant 0 : i32
    %c0_i32_1 = arith.constant 0 : i32
    return %c0_i32, %c0_i32_0 : i32, i32
  }
  func.func @transform_2(%arg0: i32) -> (i32, i32) {
    %c0_i32 = arith.constant 0 : i32
    %c0_i32_0 = arith.constant 0 : i32
    %c0_i32_1 = arith.constant 0 : i32
    return %c0_i32, %c0_i32_0 : i32, i32
  }
  func.func @transform_3(%arg0: i32) -> (i32, i32) {
    %c0_i32 = arith.constant 0 : i32
    %c0_i32_0 = arith.constant 0 : i32
    %c0_i32_1 = arith.constant 0 : i32
    return %c0_i32, %c0_i32_0 : i32, i32
  }
  func.func @transform_4(%arg0: i32) -> (i32, i32) {
    %c0_i32 = arith.constant 0 : i32
    %c0_i32_0 = arith.constant 0 : i32
    return %arg0, %c0_i32 : i32, i32
  }
}

module attributes {stable_mosaic.version = 11 : i64} {
  func.func @_layer2_logsoftmax_kernel(%arg0: i32, %arg1: memref<128x1024xbf16, #tpu.memory_space<vmem>>, %arg2: memref<1024x128xbf16, #tpu.memory_space<vmem>>, %arg3: memref<1x128xf32, #tpu.memory_space<vmem>>, %arg4: memref<128x128xf32, #tpu.memory_space<vmem>>) attributes {dimension_semantics = [#tpu.dimension_semantics<parallel>], iteration_bounds = array<i64: 8>, scalar_prefetch = 0 : i64, scratch_operands = 0 : i64, tpu.core_type = #tpu.core_type<tc>, window_params = [{transform_indices = @transform_0, window_bounds = array<i64: 128, 1024>}, {pipeline_mode = #tpu.pipeline_mode<synchronous>, transform_indices = @transform_1, window_bounds = array<i64: 1024, 128>}, {pipeline_mode = #tpu.pipeline_mode<synchronous>, transform_indices = @transform_2, window_bounds = array<i64: 1, 128>}, {transform_indices = @transform_3, window_bounds = array<i64: 128, 128>}]} {
    %c0 = arith.constant 0 : index
    %c0_0 = arith.constant 0 : index
    %0 = vector.load %arg1[%c0, %c0_0] : memref<128x1024xbf16, #tpu.memory_space<vmem>>, vector<128x1024xbf16>
    %c0_1 = arith.constant 0 : index
    %c0_2 = arith.constant 0 : index
    %1 = vector.load %arg2[%c0_1, %c0_2] : memref<1024x128xbf16, #tpu.memory_space<vmem>>, vector<1024x128xbf16>
    %cst = arith.constant dense<0.000000e+00> : vector<128x128xf32>
    %2 = tpu.matmul %0, %1, %cst {dimension_numbers = #tpu.dot_dimension_numbers<[1], [0], [0], [1], [0, 0, 1, 1], [], []>} : vector<128x1024xbf16>, vector<1024x128xbf16>, vector<128x128xf32> -> vector<128x128xf32>
    %c0_3 = arith.constant 0 : index
    %c0_4 = arith.constant 0 : index
    %3 = vector.load %arg3[%c0_3, %c0_4] : memref<1x128xf32, #tpu.memory_space<vmem>>, vector<1x128xf32>
    %4 = vector.broadcast %3 : vector<1x128xf32> to vector<128x128xf32>
    %5 = arith.addf %2, %4 : vector<128x128xf32>
    %6 = tpu.iota {dimensions = array<i32: 1>} : vector<128x128xi32>
    %c16_i32 = arith.constant 16 : i32
    %7 = vector.broadcast %c16_i32 : i32 to vector<128x128xi32>
    %8 = arith.cmpi slt, %6, %7 : vector<128x128xi32>
    %cst_5 = arith.constant 0xFF800000 : f32
    %9 = vector.broadcast %cst_5 : f32 to vector<128x128xf32>
    %10 = arith.select %8, %5, %9 : vector<128x128xi1>, vector<128x128xf32>
    %cst_6 = arith.constant dense<0xFF800000> : vector<128xf32>
    %11 = vector.multi_reduction <maximumf>, %10, %cst_6 [1] : vector<128x128xf32> to vector<128xf32>
    %12 = vector.shape_cast %11 : vector<128xf32> to vector<128x1xf32>
    %13 = vector.broadcast %12 : vector<128x1xf32> to vector<128x128xf32>
    %14 = arith.subf %5, %13 : vector<128x128xf32>
    %15 = math.exp %14 : vector<128x128xf32>
    %cst_7 = arith.constant 0.000000e+00 : f32
    %16 = vector.broadcast %cst_7 : f32 to vector<128x128xf32>
    %17 = arith.select %8, %15, %16 : vector<128x128xi1>, vector<128x128xf32>
    %cst_8 = arith.constant dense<0.000000e+00> : vector<128xf32>
    %18 = vector.multi_reduction <add>, %17, %cst_8 [1] : vector<128x128xf32> to vector<128xf32>
    %19 = vector.shape_cast %18 : vector<128xf32> to vector<128x1xf32>
    %20 = math.log %19 : vector<128x1xf32>
    %21 = vector.broadcast %20 : vector<128x1xf32> to vector<128x128xf32>
    %22 = arith.subf %14, %21 : vector<128x128xf32>
    %c0_9 = arith.constant 0 : index
    %c0_10 = arith.constant 0 : index
    %23 = vector.load %arg4[%c0_9, %c0_10] : memref<128x128xf32, #tpu.memory_space<vmem>>, vector<128x128xf32>
    tpu.vector_store %arg4[%c0_9, %c0_10], %22 {strides = array<i32>} : memref<128x128xf32, #tpu.memory_space<vmem>>, vector<128x128xf32>,
    return
  }
  func.func @transform_0(%arg0: i32) -> (i32, i32) {
    %c0_i32 = arith.constant 0 : i32
    %c0_i32_0 = arith.constant 0 : i32
    return %arg0, %c0_i32 : i32, i32
  }
  func.func @transform_1(%arg0: i32) -> (i32, i32) {
    %c0_i32 = arith.constant 0 : i32
    %c0_i32_0 = arith.constant 0 : i32
    %c0_i32_1 = arith.constant 0 : i32
    return %c0_i32, %c0_i32_0 : i32, i32
  }
  func.func @transform_2(%arg0: i32) -> (i32, i32) {
    %c0_i32 = arith.constant 0 : i32
    %c0_i32_0 = arith.constant 0 : i32
    %c0_i32_1 = arith.constant 0 : i32
    return %c0_i32, %c0_i32_0 : i32, i32
  }
  func.func @transform_3(%arg0: i32) -> (i32, i32) {
    %c0_i32 = arith.constant 0 : i32
    %c0_i32_0 = arith.constant 0 : i32
    return %arg0, %c0_i32 : i32, i32
  }
}

</mosaic_0001>

<bundles_post_ra>
// kernel: gcn_forward.3
= control target key start
LH: loop header
LB: loop body
LE: loop exit
PB: predicated region body
PF: predicated region fallthrough
CT: control target
= control target key end

     0   :  { %s2298_s12 = smov 0   ;;  %s2861_s0 = inlined_call_operand.vmem [shape: bf16[1024,1024], index: 0, kind: input, shape index: {}]   ;;  %s2862_s1 = inlined_call_operand.vmem [shape: bf16[1024,128], index: 1, kind: input, shape index: {}]   ;;  %s2863_s2 = inlined_call_operand.vmem [shape: f32[1,128], index: 2, kind: input, shape index: {}]   ;;  %s2864_s3 = inlined_call_operand.vmem [shape: f32[1024,128], index: 3, kind: output, shape index: {}]  }
   0x1 LB: > { %s1736_s13 = sadd.s32 4294967295, %s2276_s12   ;;  %p1740_p0 = scmp.ge.s32.totalorder %s2276_s12, 1  ;;  %s2276_s12 = sphi %s2298_s12, %s13_s12  }
   0x2   : > { %p139_p1 = scmp.lt.s32.totalorder %s2276_s12, 9 }
   0x4   : > { %p140_p2 = pnand %p1740_p0, %p139_p1 }
   0x5   : > { %v2142_v0 = vld [vmem:[%s2862_s1 + $0x40] sm:$0xff] (!%p140_p2)   ;;  %v2146_v4 = vld [vmem:[%s2862_s1 + $0x48] sm:$0xff] (!%p140_p2)   ;;  %v2150_v8 = vld [vmem:[%s2862_s1 + $0x50] sm:$0xff] (!%p140_p2)   ;;  %s1741_s21 = sshll.u32 (!%p140_p2), %s1736_s13, 4 }
   0x6   : > { %143 = sbr.rel (%p140_p2) target bundleno = 697 (0x2b9), region = 32  ;;  %v2143_v1 = vld [vmem:[%s2862_s1 + $0xc0] sm:$0xff] (!%p140_p2)   ;;  %1878 = vmatprep.subr.bf16.mxu0 (!%p140_p2), %v2142_v0  ;;  %v2147_v5 = vld [vmem:[%s2862_s1 + $0xc8] sm:$0xff] (!%p140_p2)   ;;  %v2151_v9 = vld [vmem:[%s2862_s1 + $0xd0] sm:$0xff] (!%p140_p2)   ;;  %p165_p3 = scmp.lt.s32.totalorder (!%p140_p2), %s1741_s21, 127 }
   0x7   : > { %v2144_v2 = vld [vmem:[%s2862_s1] sm:$0xff] (!%p140_p2)   ;;  %1942 = vmatprep.subr.bf16.mxu1 (!%p140_p2), %v2143_v1  ;;  %v2148_v6 = vld [vmem:[%s2862_s1 + $0x8] sm:$0xff] (!%p140_p2)   ;;  %v2152_v10 = vld [vmem:[%s2862_s1 + $0x10] sm:$0xff] (!%p140_p2)  }
   0x8   : > { %v2145_v3 = vld [vmem:[%s2862_s1 + $0x80] sm:$0xff] (!%p140_p2)   ;;  %1879 = vmatpush3.bf16.msra.mxu0 (!%p140_p2), %v2144_v2  ;;  %v2149_v7 = vld [vmem:[%s2862_s1 + $0x88] sm:$0xff] (!%p140_p2)   ;;  %v2153_v11 = vld [vmem:[%s2862_s1 + $0x90] sm:$0xff] (!%p140_p2)  }
   0x9   : > { %1943 = vmatpush3.bf16.msra.mxu1 (!%p140_p2), %v2145_v3  ;;  %1880 = vmatprep.subr.bf16.mxu0 (!%p140_p2), %v2146_v4  ;;  %v2154_v12 = vld [vmem:[%s2862_s1 + $0x58] sm:$0xff] (!%p140_p2)   ;;  %v2158_v16 = vld [vmem:[%s2862_s1 + $0x60] sm:$0xff] (!%p140_p2)   ;;  %v2162_v20 = vld [vmem:[%s2862_s1 + $0x68] sm:$0xff] (!%p140_p2)  }
   0xa   : > { %1944 = vmatprep.subr.bf16.mxu1 (!%p140_p2), %v2147_v5  ;;  %v2155_v13 = vld [vmem:[%s2862_s1 + $0xd8] sm:$0xff] (!%p140_p2)   ;;  %v2159_v17 = vld [vmem:[%s2862_s1 + $0xe0] sm:$0xff] (!%p140_p2)   ;;  %v2163_v21 = vld [vmem:[%s2862_s1 + $0xe8] sm:$0xff] (!%p140_p2)  }
   0xb   : > { %v2156_v14 = vld [vmem:[%s2862_s1 + $0x18] sm:$0xff] (!%p140_p2)   ;;  %v2160_v18 = vld [vmem:[%s2862_s1 + $0x20] sm:$0xff] (!%p140_p2)   ;;  %v2164_v22 = vld [vmem:[%s2862_s1 + $0x28] sm:$0xff] (!%p140_p2)  }
   0xc   : > { %1881 = vmatpush3.bf16.msra.mxu0 (!%p140_p2), %v2148_v6  ;;  %v2157_v15 = vld [vmem:[%s2862_s1 + $0x98] sm:$0xff] (!%p140_p2)   ;;  %v2161_v19 = vld [vmem:[%s2862_s1 + $0xa0] sm:$0xff] (!%p140_p2)   ;;  %v2165_v23 = vld [vmem:[%s2862_s1 + $0xa8] sm:$0xff] (!%p140_p2)  }
   0xd   : > { %1945 = vmatpush3.bf16.msra.mxu1 %v2149_v7  ;;  %1882 = vmatprep.subr.bf16.mxu0 %v2150_v8  ;;  %s2866_s21 = smov (!%p165_p3, %s1741_s21), 127  ;;  %v2166_v24 = vld [vmem:[%s2862_s1 + $0x70] sm:$0xff]   ;;  %v2170_v28 = vld [vmem:[%s2862_s1 + $0x78] sm:$0xff]   ;;  %v2174_v40 = vld [vmem:[%s2862_s1 + $0x140] sm:$0xff]  }
   0xe   : > { %1946 = vmatprep.subr.bf16.mxu1 %v2151_v9  ;;  %v2167_v25 = vld [vmem:[%s2862_s1 + $0xf0] sm:$0xff]   ;;  %s1877_s18 = sshll.u32 %s2866_s21, 5  ;;  %v2171_v29 = vld [vmem:[%s2862_s1 + $0xf8] sm:$0xff]   ;;  %v2175_v41 = vld [vmem:[%s2862_s1 + $0x100] sm:$0xff]  }
   0xf   : > { %v2168_v26 = vld [vmem:[%s2862_s1 + $0x30] sm:$0xff]   ;;  %s2404_s28 = scalar_lea.vmem %s2861_s0, %s1877_s18  ;;  %v2172_v30 = vld [vmem:[%s2862_s1 + $0x38] sm:$0xff]   ;;  %v2176_v42 = vld [vmem:[%s2862_s1 + $0x1c0] sm:$0xff]  }
  0x10   : > { %1883 = vmatpush3.bf16.msra.mxu0 %v2152_v10  ;;  %v2169_v27 = vld [vmem:[%s2862_s1 + $0xb0] sm:$0xff]   ;;  %v2173_v31 = vld [vmem:[%s2862_s1 + $0xb8] sm:$0xff]   ;;  %v178_v32 = vld [vmem:[%s2404_s28] sm:$0xff] }
  0x11   : > { %1947 = vmatpush3.bf16.msra.mxu1 %v2153_v11  ;;  %1884 = vmatprep.subr.bf16.mxu0 %v2154_v12  ;;  %v182_v33 = vld [vmem:[%s2404_s28 + $0x20] sm:$0xff]  ;;  %v179_v34 = vld [vmem:[%s2404_s28 + $0x8] sm:$0xff]  ;;  %v2182_v62 = vld [vmem:[%s2862_s1 + $0x150] sm:$0xff]  }
  0x12   : > { %1948 = vmatprep.subr.bf16.mxu1 %v2155_v13  ;;  %v1747_v35 = vcombine.low %v178_v32, %v182_v33  ;;  %v1748_v36 = vcombine.high %v178_v32, %v182_v33  ;;  %v183_v37 = vld [vmem:[%s2404_s28 + $0x28] sm:$0xff]  ;;  %v2177_v43 = vld [vmem:[%s2862_s1 + $0x180] sm:$0xff]   ;;  %v2183_v63 = vld [vmem:[%s2862_s1 + $0x110] sm:$0xff]  }
  0x13   : > { %v1749_v38 = vcombine.low %v179_v34, %v183_v37  ;;  %v1750_v39 = vcombine.high %v179_v34, %v183_v37  ;;  %v186_v44 = vld [vmem:[%s2404_s28 + $0x40] sm:$0xff]  ;;  %v187_v47 = vld [vmem:[%s2404_s28 + $0x48] sm:$0xff]  ;;  %v2184_v0 = vld [vmem:[%s2862_s1 + $0x1d0] sm:$0xff]  }
  0x14   : > { %1885 = vmatpush3.bf16.msra.mxu0 %v2156_v14  ;;  %1113 = vmatprep.mubr.bf16.mxu0 %v1748_v36  ;;  %v190_v45 = vld [vmem:[%s2404_s28 + $0x60] sm:$0xff]  ;;  %v191_v48 = vld [vmem:[%s2404_s28 + $0x68] sm:$0xff]  ;;  %v2185_v1 = vld [vmem:[%s2862_s1 + $0x190] sm:$0xff]  }
  0x15   : > { %1949 = vmatpush3.bf16.msra.mxu1 %v2157_v15  ;;  %1886 = vmatprep.subr.bf16.mxu0 %v2158_v16  ;;  %v1756_v46 = vcombine.high %v186_v44, %v190_v45  ;;  %v1758_v49 = vcombine.high %v187_v47, %v191_v48  ;;  %v2178_v50 = vld [vmem:[%s2862_s1 + $0x148] sm:$0xff]   ;;  %v1755_v51 = vcombine.low %v186_v44, %v190_v45  ;;  %v194_v56 = vld [vmem:[%s2404_s28 + $0x80] sm:$0xff]  ;;  %v2186_v10 = vld [vmem:[%s2862_s1 + $0x158] sm:$0xff]  }
  0x16   : > { %1950 = vmatprep.subr.bf16.mxu1 %v2159_v17  ;;  %1210 = vmatprep.mubr.bf16.mxu1 %v1750_v39  ;;  %v2179_v52 = vld [vmem:[%s2862_s1 + $0x108] sm:$0xff]   ;;  %v1757_v53 = vcombine.low %v187_v47, %v191_v48  ;;  %v198_v57 = vld [vmem:[%s2404_s28 + $0xa0] sm:$0xff]  ;;  %v2187_v11 = vld [vmem:[%s2862_s1 + $0x118] sm:$0xff]  }
  0x17   : > { %v2180_v54 = vld [vmem:[%s2862_s1 + $0x1c8] sm:$0xff]   ;;  %v1764_v60 = vcombine.high %v194_v56, %v198_v57  ;;  %v1763_v2 = vcombine.low %v194_v56, %v198_v57  ;;  %v202_v3 = vld [vmem:[%s2404_s28 + $0xc0] sm:$0xff]  ;;  %v2188_v12 = vld [vmem:[%s2862_s1 + $0x1d8] sm:$0xff]  }
  0x18   : > { %1887 = vmatpush3.bf16.msra.mxu0 %v2160_v18  ;;  %v2181_v55 = vld [vmem:[%s2862_s1 + $0x188] sm:$0xff]   ;;  %v206_v4 = vld [vmem:[%s2404_s28 + $0xe0] sm:$0xff]  ;;  %v2189_v13 = vld [vmem:[%s2862_s1 + $0x198] sm:$0xff]  }
  0x19   : > { %1951 = vmatpush3.bf16.msra.mxu1 %v2161_v19  ;;  %1888 = vmatprep.subr.bf16.mxu0 %v2162_v20  ;;  %v195_v58 = vld [vmem:[%s2404_s28 + $0x88] sm:$0xff]  ;;  %v1772_v7 = vcombine.high %v202_v3, %v206_v4  ;;  %v210_v14 = vld [vmem:[%s2404_s28 + $0x100] sm:$0xff]  ;;  %v1771_v19 = vcombine.low %v202_v3, %v206_v4  ;;  %v2199_v39 = vld [vmem:[%s2862_s1 + $0x130] sm:$0xff]  }
  0x1a   : > { %1952 = vmatprep.subr.bf16.mxu1 %v2163_v21  ;;  %v199_v59 = vld [vmem:[%s2404_s28 + $0xa8] sm:$0xff]  ;;  %v214_v15 = vld [vmem:[%s2404_s28 + $0x120] sm:$0xff]  ;;  %v2203_v48 = vld [vmem:[%s2862_s1 + $0x138] sm:$0xff]  }
  0x1b   : > { %v1766_v61 = vcombine.high %v195_v58, %v199_v59  ;;  %v203_v5 = vld [vmem:[%s2404_s28 + $0xc8] sm:$0xff]  ;;  %v1765_v6 = vcombine.low %v195_v58, %v199_v59  ;;  %v2190_v18 = vld [vmem:[%s2862_s1 + $0x160] sm:$0xff]   ;;  %v1779_v34 = vcombine.low %v210_v14, %v214_v15 }
  0x1c   : > { %1889 = vmatpush3.bf16.msra.mxu0 %v2164_v22  ;;  %v207_v8 = vld [vmem:[%s2404_s28 + $0xe8] sm:$0xff]  ;;  %v2191_v20 = vld [vmem:[%s2862_s1 + $0x120] sm:$0xff]   ;;  %v1780_v22 = vcombine.high %v210_v14, %v214_v15  ;;  %v196_v14 = vld [vmem:[%s2404_s28 + $0x90] sm:$0xff] }
  0x1d   : > { %1953 = vmatpush3.bf16.msra.mxu1 %v2165_v23  ;;  %1890 = vmatprep.subr.bf16.mxu0 %v2166_v24  ;;  %v1774_v9 = vcombine.high %v203_v5, %v207_v8  ;;  %v211_v16 = vld [vmem:[%s2404_s28 + $0x108] sm:$0xff]  ;;  %v1773_v21 = vcombine.low %v203_v5, %v207_v8  ;;  %v2192_v23 = vld [vmem:[%s2862_s1 + $0x1e0] sm:$0xff]   ;;  %v189_v8 = vld [vmem:[%s2404_s28 + $0x58] sm:$0xff] }
  0x1e   : > { %1954 = vmatprep.subr.bf16.mxu1 %v2167_v25  ;;  %v215_v17 = vld [vmem:[%s2404_s28 + $0x128] sm:$0xff]  ;;  %v2193_v25 = vld [vmem:[%s2862_s1 + $0x1a0] sm:$0xff]   ;;  %v200_v15 = vld [vmem:[%s2404_s28 + $0xb0] sm:$0xff] }
  0x1f   : > { %v1782_v24 = vcombine.high %v211_v16, %v215_v17  ;;  %v2196_v32 = vld [vmem:[%s2862_s1 + $0x1e8] sm:$0xff]  }
  0x20   : > { %1891 = vmatpush3.bf16.msra.mxu0 %v2168_v26  ;;  %v218_v26 = vld [vmem:[%s2404_s28 + $0x140] sm:$0xff]  ;;  %v2197_v33 = vld [vmem:[%s2862_s1 + $0x1a8] sm:$0xff]  }
  0x21   : > { %1955 = vmatpush3.bf16.msra.mxu1 %v2169_v27  ;;  %1892 = vmatprep.subr.bf16.mxu0 %v2170_v28  ;;  %v222_v27 = vld [vmem:[%s2404_s28 + $0x160] sm:$0xff]  ;;  %v2194_v28 = vld [vmem:[%s2862_s1 + $0x168] sm:$0xff]  }
  0x22   : > { %1956 = vmatprep.subr.bf16.mxu1 %v2171_v29  ;;  %v219_v29 = vld [vmem:[%s2404_s28 + $0x148] sm:$0xff]  ;;  %v1788_v36 = vcombine.high %v218_v26, %v222_v27  ;;  %v1787_v47 = vcombine.low %v218_v26, %v222_v27  ;;  %v1767_v26 = vcombine.low %v196_v14, %v200_v15 }
  0x23   : > { %v227_v44 = vld [vmem:[%s2404_s28 + $0x188] sm:$0xff] }
  0x24   : > { %1893 = vmatpush3.bf16.msra.mxu0 %v2172_v30  ;;  %v223_v30 = vld [vmem:[%s2404_s28 + $0x168] sm:$0xff] }
  0x25   : > { %1957 = vmatpush3.bf16.msra.mxu1 %v2173_v31  ;;  %2006 = vmatprep.subr.bf16.mxu0 %v2174_v40  ;;  %v2195_v31 = vld [vmem:[%s2862_s1 + $0x128] sm:$0xff]   ;;  %v1790_v37 = vcombine.high %v219_v29, %v223_v30  ;;  %v2200_v40 = vld [vmem:[%s2862_s1 + $0x1f0] sm:$0xff]  }
  0x26   : > { %2070 = vmatprep.subr.bf16.mxu1 %v2176_v42  ;;  %v230_v42 = vld [vmem:[%s2404_s28 + $0x1a0] sm:$0xff]  ;;  %v231_v45 = vld [vmem:[%s2404_s28 + $0x1a8] sm:$0xff] }
  0x27   : > { %1114 = vmatmul.mubr.bf16.vlgmr.msra.gmra.mrb[0].mxu0 %v1747_v35  ;;  %v1781_v35 = vcombine.low %v211_v16, %v215_v17  ;;  %v235_v56 = vld [vmem:[%s2404_s28 + $0x1c8] sm:$0xff]  ;;  %v1797_v59 = vcombine.low %v227_v44, %v231_v45  ;;  %v197_v16 = vld [vmem:[%s2404_s28 + $0x98] sm:$0xff] }
  0x28   : > { %1211 = vmatmul.mubr.bf16.vlgmr.msra.gmra.mrb[0].mxu1 %v1749_v38  ;;  %2007 = vmatpush3.bf16.msra.mxu0 %v2175_v41  ;;  %v2198_v38 = vld [vmem:[%s2862_s1 + $0x170] sm:$0xff]   ;;  %v226_v41 = vld [vmem:[%s2404_s28 + $0x180] sm:$0xff]  ;;  %v239_v57 = vld [vmem:[%s2404_s28 + $0x1e8] sm:$0xff] }
  0x29   : > { %2071 = vmatpush3.bf16.msra.mxu1 %v2177_v43  ;;  %1121 = vmatprep.mubr.bf16.mxu0 %v1756_v46  ;;  %v2201_v43 = vld [vmem:[%s2862_s1 + $0x1b0] sm:$0xff]   ;;  %v2202_v46 = vld [vmem:[%s2862_s1 + $0x178] sm:$0xff]   ;;  %v1795_v58 = vcombine.low %v226_v41, %v230_v42  ;;  %v1805_v3 = vcombine.low %v235_v56, %v239_v57 }
  0x2a   : > { %1218 = vmatprep.mubr.bf16.mxu1 %v1758_v49  ;;  %2008 = vmatprep.subr.bf16.mxu0 %v2178_v50  ;;  %v1789_v49 = vcombine.low %v219_v29, %v223_v30  ;;  %v1796_v50 = vcombine.high %v226_v41, %v230_v42  ;;  %v201_v17 = vld [vmem:[%s2404_s28 + $0xb8] sm:$0xff]  ;;  %v212_v30 = vld [vmem:[%s2404_s28 + $0x110] sm:$0xff] }
  0x2b   : > { %2072 = vmatprep.subr.bf16.mxu1 %v2180_v54  ;;  %v234_v54 = vld [vmem:[%s2404_s28 + $0x1c0] sm:$0xff]  ;;  %v1769_v27 = vcombine.low %v197_v16, %v201_v17  ;;  %v225_v41 = vld [vmem:[%s2404_s28 + $0x178] sm:$0xff] }
  0x2c   : > { %2009 = vmatpush3.bf16.msra.mxu0 %v2179_v52  ;;  %v1798_v52 = vcombine.high %v227_v44, %v231_v45 }
  0x2d   : > { %2073 = vmatpush3.bf16.msra.mxu1 %v2181_v55  ;;  %2010 = vmatprep.subr.bf16.mxu0 %v2182_v62  ;;  %v238_v55 = vld [vmem:[%s2404_s28 + $0x1e0] sm:$0xff]  ;;  %v180_v62 = vld [vmem:[%s2404_s28 + $0x10] sm:$0xff] }
  0x2e   : > { %2074 = vmatprep.subr.bf16.mxu1 %v2184_v0  ;;  %v181_v0 = vld [vmem:[%s2404_s28 + $0x18] sm:$0xff] }
  0x2f   : > { %1122 = vmatmul.mubr.bf16.gmra.mrb[4].mxu0 %v1755_v51  ;;  %v2204_v51 = vld [vmem:[%s2862_s1 + $0x1f8] sm:$0xff]  }
  0x30   : > { %1219 = vmatmul.mubr.bf16.gmra.mrb[4].mxu1 %v1757_v53  ;;  %1129 = vmatprep.mubr.bf16.mxu0 %v1764_v60  ;;  %v2205_v53 = vld [vmem:[%s2862_s1 + $0x1b8] sm:$0xff]   ;;  %v1804_v60 = vcombine.high %v234_v54, %v238_v55 }
  0x31   : > { %1226 = vmatprep.mubr.bf16.mxu1 %v1766_v61  ;;  %2011 = vmatpush3.bf16.msra.mxu0 %v2183_v63  ;;  %v1806_v61 = vcombine.high %v235_v56, %v239_v57  ;;  %v184_v63 = vld [vmem:[%s2404_s28 + $0x30] sm:$0xff]  ;;  %v237_v56 = vld [vmem:[%s2404_s28 + $0x1d8] sm:$0xff] }
  0x32   : > { %2075 = vmatpush3.bf16.msra.mxu1 %v2185_v1  ;;  %2012 = vmatprep.subr.bf16.mxu0 %v2186_v10  ;;  %v185_v1 = vld [vmem:[%s2404_s28 + $0x38] sm:$0xff]  ;;  %v1752_v4 = vcombine.high %v180_v62, %v184_v63  ;;  %v1751_v10 = vcombine.low %v180_v62, %v184_v63 }
  0x33   : > { %2076 = vmatprep.subr.bf16.mxu1 %v2188_v12  ;;  %v1754_v5 = vcombine.high %v181_v0, %v185_v1  ;;  %v241_v57 = vld [vmem:[%s2404_s28 + $0x1f8] sm:$0xff] }
  0x34   : > { %v1809_v63 = vcombine.low %v237_v56, %v241_v57 }
  0x35   : > { %2013 = vmatpush3.bf16.msra.mxu0 %v2187_v11  ;;  %v1753_v11 = vcombine.low %v181_v0, %v185_v1 }
  0x36   : > { %2077 = vmatpush3.bf16.msra.mxu1 %v2189_v13  ;;  %2014 = vmatprep.subr.bf16.mxu0 %v2190_v18 }
  0x37   : > { %1130 = vmatmul.mubr.bf16.gmra.mrb[8].mxu0 %v1763_v2  ;;  %2078 = vmatprep.subr.bf16.mxu1 %v2192_v23  ;;  %v1803_v2 = vcombine.low %v234_v54, %v238_v55  ;;  %v208_v23 = vld [vmem:[%s2404_s28 + $0xf0] sm:$0xff] }
  0x38   : > { %1227 = vmatmul.mubr.bf16.gmra.mrb[8].mxu1 %v1765_v6  ;;  %1137 = vmatprep.mubr.bf16.mxu0 %v1772_v7  ;;  %v188_v6 = vld [vmem:[%s2404_s28 + $0x50] sm:$0xff] }
  0x39   : > { %1234 = vmatprep.mubr.bf16.mxu1 %v1774_v9  ;;  %2015 = vmatpush3.bf16.msra.mxu0 %v2191_v20  ;;  %v192_v7 = vld [vmem:[%s2404_s28 + $0x70] sm:$0xff]  ;;  %v193_v9 = vld [vmem:[%s2404_s28 + $0x78] sm:$0xff]  ;;  %v1768_v20 = vcombine.high %v196_v14, %v200_v15 }
  0x3a   : > { %2079 = vmatpush3.bf16.msra.mxu1 %v2193_v25  ;;  %2016 = vmatprep.subr.bf16.mxu0 %v2194_v28  ;;  %v1760_v12 = vcombine.high %v188_v6, %v192_v7  ;;  %v1762_v13 = vcombine.high %v189_v8, %v193_v9  ;;  %v1759_v18 = vcombine.low %v188_v6, %v192_v7  ;;  %v209_v25 = vld [vmem:[%s2404_s28 + $0xf8] sm:$0xff]  ;;  %v236_v54 = vld [vmem:[%s2404_s28 + $0x1d0] sm:$0xff] }
  0x3b   : > { %2080 = vmatprep.subr.bf16.mxu1 %v2196_v32  ;;  %v213_v32 = vld [vmem:[%s2404_s28 + $0x118] sm:$0xff]  ;;  %v240_v55 = vld [vmem:[%s2404_s28 + $0x1f0] sm:$0xff] }
  0x3c   : > { %v1807_v62 = vcombine.low %v236_v54, %v240_v55 }
  0x3d   : > { %2017 = vmatpush3.bf16.msra.mxu0 %v2195_v31  ;;  %v216_v31 = vld [vmem:[%s2404_s28 + $0x130] sm:$0xff] }
  0x3e   : > { %2081 = vmatpush3.bf16.msra.mxu1 %v2197_v33  ;;  %2018 = vmatprep.subr.bf16.mxu0 %v2198_v38  ;;  %v217_v33 = vld [vmem:[%s2404_s28 + $0x138] sm:$0xff]  ;;  %v220_v38 = vld [vmem:[%s2404_s28 + $0x150] sm:$0xff]  ;;  %v1783_v42 = vcombine.low %v212_v30, %v216_v31 }
  0x3f   : > { %1138 = vmatmul.mubr.bf16.gmra.mrb[12].mxu0 %v1771_v19  ;;  %2082 = vmatprep.subr.bf16.mxu1 %v2200_v40  ;;  %v1761_v19 = vcombine.low %v189_v8, %v193_v9  ;;  %v221_v40 = vld [vmem:[%s2404_s28 + $0x158] sm:$0xff] }
  0x40   : > { %1235 = vmatmul.mubr.bf16.gmra.mrb[12].mxu1 %v1773_v21  ;;  %1145 = vmatprep.mubr.bf16.mxu0 %v1780_v22  ;;  %v1770_v21 = vcombine.high %v197_v16, %v201_v17  ;;  %v204_v22 = vld [vmem:[%s2404_s28 + $0xd0] sm:$0xff]  ;;  %v1794_v45 = vcombine.high %v221_v40, %v225_v41 }
  0x41   : > { %1242 = vmatprep.mubr.bf16.mxu1 %v1782_v24  ;;  %2019 = vmatpush3.bf16.msra.mxu0 %v2199_v39  ;;  %v205_v24 = vld [vmem:[%s2404_s28 + $0xd8] sm:$0xff]  ;;  %v1776_v28 = vcombine.high %v204_v22, %v208_v23  ;;  %v224_v39 = vld [vmem:[%s2404_s28 + $0x170] sm:$0xff] }
  0x42   : > { %2083 = vmatpush3.bf16.msra.mxu1 %v2201_v43  ;;  %2020 = vmatprep.subr.bf16.mxu0 %v2202_v46  ;;  %v1778_v29 = vcombine.high %v205_v24, %v209_v25  ;;  %v1785_v43 = vcombine.low %v213_v32, %v217_v33  ;;  %v1792_v44 = vcombine.high %v220_v38, %v224_v39  ;;  %v228_v46 = vld [vmem:[%s2404_s28 + $0x190] sm:$0xff] }
  0x43   : > { %2084 = vmatprep.subr.bf16.mxu1 %v2204_v51  ;;  %v1793_v51 = vcombine.low %v221_v40, %v225_v41 }
  0x45   : > { %2021 = vmatpush3.bf16.msra.mxu0 %v2203_v48  ;;  %v229_v48 = vld [vmem:[%s2404_s28 + $0x198] sm:$0xff] }
  0x46   : > { %2085 = vmatpush3.bf16.msra.mxu1 %v2205_v53 }
  0x47   : > { %1146 = vmatmul.mubr.bf16.gmra.mrb[16].mxu0 %v1779_v34  ;;  %v1775_v34 = vcombine.low %v204_v22, %v208_v23 }
  0x48   : > { %1243 = vmatmul.mubr.bf16.gmra.mrb[16].mxu1 %v1781_v35  ;;  %1153 = vmatprep.mubr.bf16.mxu0 %v1788_v36  ;;  %v1777_v35 = vcombine.low %v205_v24, %v209_v25  ;;  %v1784_v36 = vcombine.high %v212_v30, %v216_v31 }
  0x49   : > { %1250 = vmatprep.mubr.bf16.mxu1 %v1790_v37  ;;  %v1786_v37 = vcombine.high %v213_v32, %v217_v33 }
  0x4f   : > { %1154 = vmatmul.mubr.bf16.gmra.mrb[20].mxu0 %v1787_v47  ;;  %v232_v47 = vld [vmem:[%s2404_s28 + $0x1b0] sm:$0xff] }
  0x50   : > { %1251 = vmatmul.mubr.bf16.gmra.mrb[20].mxu1 %v1789_v49  ;;  %1161 = vmatprep.mubr.bf16.mxu0 %v1796_v50  ;;  %v233_v49 = vld [vmem:[%s2404_s28 + $0x1b8] sm:$0xff]  ;;  %v1791_v50 = vcombine.low %v220_v38, %v224_v39  ;;  %s1745_s28 = sshll.u32 %s2866_s21, 3 }
  0x51   : > { %1258 = vmatprep.mubr.bf16.mxu1 %v1798_v52  ;;  %v1800_v52 = vcombine.high %v228_v46, %v232_v47  ;;  %v1802_v53 = vcombine.high %v229_v48, %v233_v49  ;;  %s2824_s29 = scalar_lea.vmem %s2864_s3, %s1745_s28 }
  0x57   : > { %1162 = vmatmul.mubr.bf16.gmra.mrb[24].mxu0 %v1795_v58  ;;  %v1799_v58 = vcombine.low %v228_v46, %v232_v47 }
  0x58   : > { %1259 = vmatmul.mubr.bf16.gmra.mrb[24].mxu1 %v1797_v59  ;;  %1169 = vmatprep.mubr.bf16.mxu0 %v1804_v60  ;;  %v1801_v59 = vcombine.low %v229_v48, %v233_v49  ;;  %v1808_v60 = vcombine.high %v236_v54, %v240_v55 }
  0x59   : > { %1266 = vmatprep.mubr.bf16.mxu1 %v1806_v61  ;;  %v1810_v61 = vcombine.high %v237_v56, %v241_v57 }
  0x5f   : > { %1170 = vmatmul.mubr.bf16.gmra.mrb[28].mxu0 %v1803_v2  ;;  %v2575_v2 = vld [vmem:[%s2863_s2] ss:$0 sm:$0xff] }
  0x60   : > { %1267 = vmatmul.mubr.bf16.gmra.mrb[28].mxu1 %v1805_v3  ;;  %1307 = vmatprep.mubr.bf16.mxu0 %v1752_v4 }
  0x61   : > { %1404 = vmatprep.mubr.bf16.mxu1 %v1754_v5 }
  0x67   : > { %1308 = vmatmul.mubr.bf16.vlgmr.msra.gmra.mrb[32].mxu0 %v1751_v10 }
  0x68   : > { %1405 = vmatmul.mubr.bf16.vlgmr.msra.gmra.mrb[32].mxu1 %v1753_v11  ;;  %1315 = vmatprep.mubr.bf16.mxu0 %v1760_v12 }
  0x69   : > { %1412 = vmatprep.mubr.bf16.mxu1 %v1762_v13 }
  0x6f   : > { %1316 = vmatmul.mubr.bf16.gmra.mrb[36].mxu0 %v1759_v18 }
  0x70   : > { %1413 = vmatmul.mubr.bf16.gmra.mrb[36].mxu1 %v1761_v19  ;;  %1323 = vmatprep.mubr.bf16.mxu0 %v1768_v20 }
  0x71   : > { %1420 = vmatprep.mubr.bf16.mxu1 %v1770_v21 }
  0x77   : > { %1324 = vmatmul.mubr.bf16.gmra.mrb[40].mxu0 %v1767_v26 }
  0x78   : > { %1421 = vmatmul.mubr.bf16.gmra.mrb[40].mxu1 %v1769_v27  ;;  %1331 = vmatprep.mubr.bf16.mxu0 %v1776_v28 }
  0x79   : > { %1428 = vmatprep.mubr.bf16.mxu1 %v1778_v29 }
  0x7f   : > { %1332 = vmatmul.mubr.bf16.gmra.mrb[44].mxu0 %v1775_v34 }
  0x80   : > { %1429 = vmatmul.mubr.bf16.gmra.mrb[44].mxu1 %v1777_v35  ;;  %1339 = vmatprep.mubr.bf16.mxu0 %v1784_v36 }
  0x81   : > { %1436 = vmatprep.mubr.bf16.mxu1 %v1786_v37 }
  0x87   : > { %1340 = vmatmul.mubr.bf16.gmra.mrb[48].mxu0 %v1783_v42 }
  0x88   : > { %1437 = vmatmul.mubr.bf16.gmra.mrb[48].mxu1 %v1785_v43  ;;  %1347 = vmatprep.mubr.bf16.mxu0 %v1792_v44 }
  0x89   : > { %1444 = vmatprep.mubr.bf16.mxu1 %v1794_v45 }
  0x8f   : > { %1348 = vmatmul.mubr.bf16.gmra.mrb[52].mxu0 %v1791_v50 }
  0x90   : > { %1445 = vmatmul.mubr.bf16.gmra.mrb[52].mxu1 %v1793_v51  ;;  %1355 = vmatprep.mubr.bf16.mxu0 %v1800_v52 }
  0x91   : > { %1452 = vmatprep.mubr.bf16.mxu1 %v1802_v53 }
  0x97   : > { %1356 = vmatmul.mubr.bf16.gmra.mrb[56].mxu0 %v1799_v58 }
  0x98   : > { %1453 = vmatmul.mubr.bf16.gmra.mrb[56].mxu1 %v1801_v59  ;;  %1363 = vmatprep.mubr.bf16.mxu0 %v1808_v60 }
  0x99   : > { %1460 = vmatprep.mubr.bf16.mxu1 %v1810_v61 }
  0x9f   : > { %1364 = vmatmul.mubr.bf16.gmra.mrb[60].mxu0 %v1807_v62 }
  0xa0   : > { %1461 = vmatmul.mubr.bf16.gmra.mrb[60].mxu1 %v1809_v63 }
  0xfa   : > { %v1894_v0 = vpop.f32.mrb[0].mxu0 }
  0xfb   : > { %v1958_v1 = vpop.f32.mrb[0].mxu1  ;;  %v1895_v3 = vpop.f32.mrb[1].mxu0 }
  0xfc   : > { %v1896_v4 = vadd.f32 %v1895_v3, %v1894_v0  ;;  %v1959_v5 = vpop.f32.mrb[1].mxu1  ;;  %v1897_v6 = vpop.f32.mrb[2].mxu0 }
  0xfd   : > { %v1960_v7 = vadd.f32 %v1959_v5, %v1958_v1  ;;  %v1961_v8 = vpop.f32.mrb[2].mxu1  ;;  %v1898_v9 = vpop.f32.mrb[3].mxu0 }
  0xfe   : > { %v1116_v10 = vadd.f32 %v1896_v4, %v2575_v2  ;;  %v1899_v11 = vadd.f32 %v1898_v9, %v1897_v6  ;;  %v1962_v12 = vpop.f32.mrb[3].mxu1 }
  0xff   : > { %v1963_v13 = vadd.f32 %v1962_v12, %v1961_v8 }
 0x100   : > { %v2578_v14 = vadd.f32 %v1960_v7, %v1116_v10  ;;  %v1119_v15 = vadd.f32 %v1899_v11, %v2575_v2 }
 0x102   : > { %v2581_v16 = vadd.f32 %v1963_v13, %v1119_v15  ;;  %v1900_v17 = vpop.f32.mrb[4].mxu0 }
 0x103   : > { %v1964_v18 = vpop.f32.mrb[4].mxu1  ;;  %v1901_v19 = vpop.f32.mrb[5].mxu0 }
 0x104   : > { %v1902_v20 = vadd.f32 %v1901_v19, %v1900_v17  ;;  %v1965_v21 = vpop.f32.mrb[5].mxu1  ;;  %v1903_v22 = vpop.f32.mrb[6].mxu0 }
 0x105   : > { %v1966_v23 = vadd.f32 %v1965_v21, %v1964_v18  ;;  %v1967_v24 = vpop.f32.mrb[6].mxu1  ;;  %v1904_v25 = vpop.f32.mrb[7].mxu0 }
 0x106   : > { %v1124_v26 = vadd.f32 %v1902_v20, %v2575_v2  ;;  %v1905_v27 = vadd.f32 %v1904_v25, %v1903_v22  ;;  %v1968_v28 = vpop.f32.mrb[7].mxu1 }
 0x107   : > { %v1969_v29 = vadd.f32 %v1968_v28, %v1967_v24 }
 0x108   : > { %v2584_v30 = vadd.f32 %v1966_v23, %v1124_v26  ;;  %v1127_v31 = vadd.f32 %v1905_v27, %v2575_v2 }
 0x10a   : > { %v2587_v32 = vadd.f32 %v1969_v29, %v1127_v31  ;;  %v1906_v33 = vpop.f32.mrb[8].mxu0 }
 0x10b   : > { %v1970_v34 = vpop.f32.mrb[8].mxu1  ;;  %v1907_v35 = vpop.f32.mrb[9].mxu0 }
 0x10c   : > { %v1908_v36 = vadd.f32 %v1907_v35, %v1906_v33  ;;  %v1971_v37 = vpop.f32.mrb[9].mxu1  ;;  %v1909_v38 = vpop.f32.mrb[10].mxu0 }
 0x10d   : > { %v1972_v39 = vadd.f32 %v1971_v37, %v1970_v34  ;;  %v1973_v40 = vpop.f32.mrb[10].mxu1  ;;  %v1910_v41 = vpop.f32.mrb[11].mxu0 }
 0x10e   : > { %v1132_v42 = vadd.f32 %v1908_v36, %v2575_v2  ;;  %v1911_v43 = vadd.f32 %v1910_v41, %v1909_v38  ;;  %v1974_v44 = vpop.f32.mrb[11].mxu1 }
 0x10f   : > { %v1975_v45 = vadd.f32 %v1974_v44, %v1973_v40 }
 0x110   : > { %v2590_v46 = vadd.f32 %v1972_v39, %v1132_v42  ;;  %v1135_v47 = vadd.f32 %v1911_v43, %v2575_v2 }
 0x112   : > { %v2593_v48 = vadd.f32 %v1975_v45, %v1135_v47  ;;  %v1912_v49 = vpop.f32.mrb[12].mxu0 }
 0x113   : > { %v1976_v50 = vpop.f32.mrb[12].mxu1  ;;  %v1913_v51 = vpop.f32.mrb[13].mxu0 }
 0x114   : > { %v1914_v52 = vadd.f32 %v1913_v51, %v1912_v49  ;;  %v1977_v53 = vpop.f32.mrb[13].mxu1  ;;  %v1915_v54 = vpop.f32.mrb[14].mxu0 }
 0x115   : > { %v1978_v55 = vadd.f32 %v1977_v53, %v1976_v50  ;;  %v1979_v56 = vpop.f32.mrb[14].mxu1  ;;  %v1916_v57 = vpop.f32.mrb[15].mxu0 }
 0x116   : > { %v1140_v58 = vadd.f32 %v1914_v52, %v2575_v2  ;;  %v1917_v59 = vadd.f32 %v1916_v57, %v1915_v54  ;;  %v1980_v60 = vpop.f32.mrb[15].mxu1 }
 0x117   : > { %v1981_v61 = vadd.f32 %v1980_v60, %v1979_v56 }
 0x118   : > { %v2596_v62 = vadd.f32 %v1978_v55, %v1140_v58  ;;  %v1143_v63 = vadd.f32 %v1917_v59, %v2575_v2 }
 0x11a   : > { %v2599_v0 = vadd.f32 %v1981_v61, %v1143_v63  ;;  %v1918_v1 = vpop.f32.mrb[16].mxu0 }
 0x11b   : > { %v1982_v3 = vpop.f32.mrb[16].mxu1  ;;  %v1919_v4 = vpop.f32.mrb[17].mxu0 }
 0x11c   : > { %v1920_v5 = vadd.f32 %v1919_v4, %v1918_v1  ;;  %v1983_v6 = vpop.f32.mrb[17].mxu1  ;;  %v1921_v7 = vpop.f32.mrb[18].mxu0 }
 0x11d   : > { %v1984_v8 = vadd.f32 %v1983_v6, %v1982_v3  ;;  %v1985_v9 = vpop.f32.mrb[18].mxu1  ;;  %v1922_v10 = vpop.f32.mrb[19].mxu0 }
 0x11e   : > { %v1148_v11 = vadd.f32 %v1920_v5, %v2575_v2  ;;  %v1923_v12 = vadd.f32 %v1922_v10, %v1921_v7  ;;  %v1986_v13 = vpop.f32.mrb[19].mxu1 }
 0x11f   : > { %v1987_v15 = vadd.f32 %v1986_v13, %v1985_v9 }
 0x120   : > { %v2602_v17 = vadd.f32 %v1984_v8, %v1148_v11  ;;  %v1151_v18 = vadd.f32 %v1923_v12, %v2575_v2  ;;  %v1469_v8 = vlaneseq }
 0x122   : > { %v2605_v19 = vadd.f32 %v1987_v15, %v1151_v18  ;;  %v1924_v20 = vpop.f32.mrb[20].mxu0  ;;  %v2625_v18 = vand.u32 127, %v1469_v8 }
 0x123   : > { %v1988_v21 = vpop.f32.mrb[20].mxu1  ;;  %v1925_v22 = vpop.f32.mrb[21].mxu0 }
 0x124   : > { %v1926_v23 = vadd.f32 %v1925_v22, %v1924_v20  ;;  %v1989_v24 = vpop.f32.mrb[21].mxu1  ;;  %v1927_v25 = vpop.f32.mrb[22].mxu0  ;;  %vm1471_vm0 = vcmp.lt.s32.totalorder %v2625_v18, 16 }
 0x125   : > { %v1990_v26 = vadd.f32 %v1989_v24, %v1988_v21  ;;  %v1991_v27 = vpop.f32.mrb[22].mxu1  ;;  %v1928_v28 = vpop.f32.mrb[23].mxu0 }
 0x126   : > { %v1156_v29 = vadd.f32 %v1926_v23, %v2575_v2  ;;  %v1929_v31 = vadd.f32 %v1928_v28, %v1927_v25  ;;  %v1992_v33 = vpop.f32.mrb[23].mxu1 }
 0x127   : > { %v1993_v34 = vadd.f32 %v1992_v33, %v1991_v27 }
 0x128   : > { %v2608_v35 = vadd.f32 %v1990_v26, %v1156_v29  ;;  %v1159_v36 = vadd.f32 %v1929_v31, %v2575_v2 }
 0x12a   : > { %v2611_v37 = vadd.f32 %v1993_v34, %v1159_v36  ;;  %v1930_v38 = vpop.f32.mrb[24].mxu0 }
 0x12b   : > { %v1994_v39 = vpop.f32.mrb[24].mxu1  ;;  %v1931_v40 = vpop.f32.mrb[25].mxu0 }
 0x12c   : > { %v1932_v41 = vadd.f32 %v1931_v40, %v1930_v38  ;;  %v1995_v42 = vpop.f32.mrb[25].mxu1  ;;  %v1933_v43 = vpop.f32.mrb[26].mxu0 }
 0x12d   : > { %v1996_v44 = vadd.f32 %v1995_v42, %v1994_v39  ;;  %v1997_v45 = vpop.f32.mrb[26].mxu1  ;;  %v1934_v47 = vpop.f32.mrb[27].mxu0 }
 0x12e   : > { %v1164_v49 = vadd.f32 %v1932_v41, %v2575_v2  ;;  %v1935_v50 = vadd.f32 %v1934_v47, %v1933_v43  ;;  %v1998_v51 = vpop.f32.mrb[27].mxu1 }
 0x12f   : > { %v1999_v52 = vadd.f32 %v1998_v51, %v1997_v45 }
 0x130   : > { %v2614_v53 = vadd.f32 %v1996_v44, %v1164_v49  ;;  %v1167_v54 = vadd.f32 %v1935_v50, %v2575_v2 }
 0x132   : > { %v2617_v55 = vadd.f32 %v1999_v52, %v1167_v54  ;;  %v1936_v56 = vpop.f32.mrb[28].mxu0 }
 0x133   : > { %v2000_v57 = vpop.f32.mrb[28].mxu1  ;;  %v1937_v58 = vpop.f32.mrb[29].mxu0 }
 0x134   : > { %v1938_v59 = vadd.f32 %v1937_v58, %v1936_v56  ;;  %v2001_v60 = vpop.f32.mrb[29].mxu1  ;;  %v1939_v61 = vpop.f32.mrb[30].mxu0 }
 0x135   : > { %v2002_v63 = vadd.f32 %v2001_v60, %v2000_v57  ;;  %v2003_v1 = vpop.f32.mrb[30].mxu1  ;;  %v1940_v3 = vpop.f32.mrb[31].mxu0 }
 0x136   : > { %v1172_v4 = vadd.f32 %v1938_v59, %v2575_v2  ;;  %v1941_v5 = vadd.f32 %v1940_v3, %v1939_v61  ;;  %v2004_v6 = vpop.f32.mrb[31].mxu1 }
 0x137   : > { %v2005_v7 = vadd.f32 %v2004_v6, %v2003_v1 }
 0x138   : > { %v2620_v9 = vadd.f32 %v2002_v63, %v1172_v4  ;;  %v1175_v10 = vadd.f32 %v1941_v5, %v2575_v2 }
 0x13a   : > { %v2623_v11 = vadd.f32 %v2005_v7, %v1175_v10  ;;  %v2022_v12 = vpop.f32.mrb[32].mxu0 }
 0x13b   : > { %v2086_v13 = vpop.f32.mrb[32].mxu1  ;;  %v2023_v15 = vpop.f32.mrb[33].mxu0 }
 0x13c   : > { %v2024_v20 = vadd.f32 %v2023_v15, %v2022_v12  ;;  %v2087_v21 = vpop.f32.mrb[33].mxu1  ;;  %v2025_v22 = vpop.f32.mrb[34].mxu0 }
 0x13d   : > { %v2088_v23 = vadd.f32 %v2087_v21, %v2086_v13  ;;  %v2089_v24 = vpop.f32.mrb[34].mxu1  ;;  %v2026_v25 = vpop.f32.mrb[35].mxu0 }
 0x13e   : > { %v1310_v26 = vadd.f32 %v2024_v20, %v2578_v14  ;;  %v2027_v27 = vadd.f32 %v2026_v25, %v2025_v22  ;;  %v2090_v28 = vpop.f32.mrb[35].mxu1 }
 0x13f   : > { %v2091_v29 = vadd.f32 %v2090_v28, %v2089_v24 }
 0x140   : > { %v1313_v2 = vadd.f32 %v2027_v27, %v2581_v16  ;;  %v2630_v31 = vadd.f32 %v2088_v23, %v1310_v26 }
 0x142   : > { %v2028_v33 = vpop.f32.mrb[36].mxu0  ;;  %v1472_v34 = vsel %vm1471_vm0, %v2630_v31, -inf  ;;  %v2635_v36 = vadd.f32 %v2091_v29, %v1313_v2 }
 0x143   : > { %v2092_v38 = vpop.f32.mrb[36].mxu1  ;;  %v2029_v39 = vpop.f32.mrb[37].mxu0  ;;  %1488 = vmax.xlane.f32.xlu0 %v1472_v34 }
 0x144   : > { %v2030_v14 = vadd.f32 %v2029_v39, %v2028_v33  ;;  %v2093_v40 = vpop.f32.mrb[37].mxu1  ;;  %v2031_v41 = vpop.f32.mrb[38].mxu0  ;;  %v1473_v49 = vsel %vm1471_vm0, %v2635_v36, -inf }
 0x145   : > { %v2094_v42 = vadd.f32 %v2093_v40, %v2092_v38  ;;  %v2095_v43 = vpop.f32.mrb[38].mxu1  ;;  %v2032_v44 = vpop.f32.mrb[39].mxu0 }
 0x146   : > { %v1318_v16 = vadd.f32 %v2030_v14, %v2584_v30  ;;  %v2033_v45 = vadd.f32 %v2032_v44, %v2031_v41  ;;  %v2096_v47 = vpop.f32.mrb[39].mxu1 }
 0x147   : > { %v2097_v50 = vadd.f32 %v2096_v47, %v2095_v43  ;;  %1490 = vmax.xlane.f32.xlu0 %v1473_v49 }
 0x148   : > { %v1321_v51 = vadd.f32 %v2033_v45, %v2587_v32  ;;  %v2642_v52 = vadd.f32 %v2094_v42, %v1318_v16 }
 0x14a   : > { %v2034_v54 = vpop.f32.mrb[40].mxu0  ;;  %v1474_v56 = vsel %vm1471_vm0, %v2642_v52, -inf  ;;  %v2647_v57 = vadd.f32 %v2097_v50, %v1321_v51 }
 0x14b   : > { %v2098_v30 = vpop.f32.mrb[40].mxu1  ;;  %v2035_v58 = vpop.f32.mrb[41].mxu0  ;;  %1492 = vmax.xlane.f32.xlu1 %v1474_v56 }
 0x14c   : > { %v2036_v59 = vadd.f32 %v2035_v58, %v2034_v54  ;;  %v2099_v60 = vpop.f32.mrb[41].mxu1  ;;  %v2037_v61 = vpop.f32.mrb[42].mxu0  ;;  %v1475_v6 = vsel %vm1471_vm0, %v2647_v57, -inf }
 0x14d   : > { %v2100_v63 = vadd.f32 %v2099_v60, %v2098_v30  ;;  %v2101_v1 = vpop.f32.mrb[42].mxu1  ;;  %v2038_v3 = vpop.f32.mrb[43].mxu0 }
 0x14e   : > { %v1326_v32 = vadd.f32 %v2036_v59, %v2590_v46  ;;  %v2039_v4 = vadd.f32 %v2038_v3, %v2037_v61  ;;  %v2102_v5 = vpop.f32.mrb[43].mxu1 }
 0x14f   : > { %v2103_v7 = vadd.f32 %v2102_v5, %v2101_v1  ;;  %1494 = vmax.xlane.f32.xlu1 %v1475_v6 }
 0x150   : > { %v1329_v8 = vadd.f32 %v2039_v4, %v2593_v48  ;;  %v2654_v10 = vadd.f32 %v2100_v63, %v1326_v32 }
 0x152   : > { %v2040_v12 = vpop.f32.mrb[44].mxu0  ;;  %v1476_v13 = vsel %vm1471_vm0, %v2654_v10, -inf  ;;  %v2659_v15 = vadd.f32 %v2103_v7, %v1329_v8 }
 0x153   : > { %v2104_v46 = vpop.f32.mrb[44].mxu1  ;;  %v2041_v20 = vpop.f32.mrb[45].mxu0  ;;  %1496 = vmax.xlane.f32.xlu0 %v1476_v13 }
 0x154   : > { %v2042_v21 = vadd.f32 %v2041_v20, %v2040_v12  ;;  %v2105_v22 = vpop.f32.mrb[45].mxu1  ;;  %v2043_v23 = vpop.f32.mrb[46].mxu0  ;;  %v1477_v24 = vsel %vm1471_vm0, %v2659_v15, -inf }
 0x155   : > { %v2106_v48 = vadd.f32 %v2105_v22, %v2104_v46  ;;  %v2107_v25 = vpop.f32.mrb[46].mxu1  ;;  %v2044_v26 = vpop.f32.mrb[47].mxu0  ;;  %1498 = vmax.xlane.f32.xlu1 %v1477_v24 }
 0x156   : > { %v1334_v27 = vadd.f32 %v2042_v21, %v2596_v62  ;;  %v2045_v28 = vadd.f32 %v2044_v26, %v2043_v23  ;;  %v2108_v29 = vpop.f32.mrb[47].mxu1 }
 0x157   : > { %v2109_v2 = vadd.f32 %v2108_v29, %v2107_v25 }
 0x158   : > { %v1337_v33 = vadd.f32 %v2045_v28, %v2599_v0  ;;  %v2666_v34 = vadd.f32 %v2106_v48, %v1334_v27 }
 0x15a   : > { %v2046_v38 = vpop.f32.mrb[48].mxu0  ;;  %v1478_v39 = vsel %vm1471_vm0, %v2666_v34, -inf  ;;  %v2671_v14 = vadd.f32 %v2109_v2, %v1337_v33 }
 0x15b   : > { %v2110_v40 = vpop.f32.mrb[48].mxu1  ;;  %v2047_v41 = vpop.f32.mrb[49].mxu0  ;;  %1500 = vmax.xlane.f32.xlu0 %v1478_v39 }
 0x15c   : > { %v2048_v42 = vadd.f32 %v2047_v41, %v2046_v38  ;;  %v2111_v43 = vpop.f32.mrb[49].mxu1  ;;  %v2049_v62 = vpop.f32.mrb[50].mxu0  ;;  %v1479_v44 = vsel %vm1471_vm0, %v2671_v14, -inf }
 0x15d   : > { %v2112_v0 = vadd.f32 %v2111_v43, %v2110_v40  ;;  %v2113_v16 = vpop.f32.mrb[50].mxu1  ;;  %v2050_v45 = vpop.f32.mrb[51].mxu0  ;;  %1502 = vmax.xlane.f32.xlu1 %v1479_v44 }
 0x15e   : > { %v1342_v47 = vadd.f32 %v2048_v42, %v2602_v17  ;;  %v2051_v49 = vadd.f32 %v2050_v45, %v2049_v62  ;;  %v2114_v50 = vpop.f32.mrb[51].mxu1 }
 0x15f   : > { %v2115_v51 = vadd.f32 %v2114_v50, %v2113_v16 }
 0x160   : > { %v1345_v54 = vadd.f32 %v2051_v49, %v2605_v19  ;;  %v2678_v56 = vadd.f32 %v2112_v0, %v1342_v47 }
 0x162   : > { %v2052_v30 = vpop.f32.mrb[52].mxu0  ;;  %v1480_v58 = vsel %vm1471_vm0, %v2678_v56, -inf  ;;  %v2683_v59 = vadd.f32 %v2115_v51, %v1345_v54 }
 0x163   : > { %v2116_v60 = vpop.f32.mrb[52].mxu1  ;;  %v2053_v61 = vpop.f32.mrb[53].mxu0  ;;  %1504 = vmax.xlane.f32.xlu0 %v1480_v58 }
 0x164   : > { %v2054_v63 = vadd.f32 %v2053_v61, %v2052_v30  ;;  %v2117_v1 = vpop.f32.mrb[53].mxu1  ;;  %v2055_v17 = vpop.f32.mrb[54].mxu0  ;;  %v1481_v3 = vsel %vm1471_vm0, %v2683_v59, -inf }
 0x165   : > { %v2118_v19 = vadd.f32 %v2117_v1, %v2116_v60  ;;  %v2119_v32 = vpop.f32.mrb[54].mxu1  ;;  %v2056_v4 = vpop.f32.mrb[55].mxu0  ;;  %1506 = vmax.xlane.f32.xlu1 %v1481_v3 }
 0x166   : > { %v1350_v5 = vadd.f32 %v2054_v63, %v2608_v35  ;;  %v2057_v6 = vadd.f32 %v2056_v4, %v2055_v17  ;;  %v2120_v7 = vpop.f32.mrb[55].mxu1 }
 0x167   : > { %v2121_v8 = vadd.f32 %v2120_v7, %v2119_v32 }
 0x168   : > { %v1353_v12 = vadd.f32 %v2057_v6, %v2611_v37  ;;  %v2690_v13 = vadd.f32 %v2118_v19, %v1350_v5 }
 0x16a   : > { %v2058_v46 = vpop.f32.mrb[56].mxu0  ;;  %v1482_v20 = vsel %vm1471_vm0, %v2690_v13, -inf  ;;  %v2695_v21 = vadd.f32 %v2121_v8, %v1353_v12 }
 0x16b   : > { %v2122_v22 = vpop.f32.mrb[56].mxu1  ;;  %v2059_v23 = vpop.f32.mrb[57].mxu0  ;;  %1508 = vmax.xlane.f32.xlu0 %v1482_v20 }
 0x16c   : > { %v2060_v24 = vadd.f32 %v2059_v23, %v2058_v46  ;;  %v2123_v48 = vpop.f32.mrb[57].mxu1  ;;  %v2061_v35 = vpop.f32.mrb[58].mxu0  ;;  %v1483_v25 = vsel %vm1471_vm0, %v2695_v21, -inf }
 0x16d   : > { %v2124_v37 = vadd.f32 %v2123_v48, %v2122_v22  ;;  %v2125_v26 = vpop.f32.mrb[58].mxu1  ;;  %v2062_v27 = vpop.f32.mrb[59].mxu0  ;;  %1510 = vmax.xlane.f32.xlu1 %v1483_v25 }
 0x16e   : > { %v1358_v28 = vadd.f32 %v2060_v24, %v2614_v53  ;;  %v2063_v29 = vadd.f32 %v2062_v27, %v2061_v35  ;;  %v2126_v2 = vpop.f32.mrb[59].mxu1 }
 0x16f   : > { %v2127_v33 = vadd.f32 %v2126_v2, %v2125_v26 }
 0x170   : > { %v1361_v38 = vadd.f32 %v2063_v29, %v2617_v55  ;;  %v2702_v39 = vadd.f32 %v2124_v37, %v1358_v28 }
 0x172   : > { %v2064_v40 = vpop.f32.mrb[60].mxu0  ;;  %v1484_v41 = vsel %vm1471_vm0, %v2702_v39, -inf  ;;  %v2707_v42 = vadd.f32 %v2127_v33, %v1361_v38 }
 0x173   : > { %v2128_v43 = vpop.f32.mrb[60].mxu1  ;;  %v2065_v62 = vpop.f32.mrb[61].mxu0  ;;  %1512 = vmax.xlane.f32.xlu0 %v1484_v41 }
 0x174   : > { %v2066_v44 = vadd.f32 %v2065_v62, %v2064_v40  ;;  %v2129_v0 = vpop.f32.mrb[61].mxu1  ;;  %v2067_v53 = vpop.f32.mrb[62].mxu0  ;;  %v1485_v16 = vsel %vm1471_vm0, %v2707_v42, -inf }
 0x175   : > { %v2130_v55 = vadd.f32 %v2129_v0, %v2128_v43  ;;  %v2131_v45 = vpop.f32.mrb[62].mxu1  ;;  %v2068_v47 = vpop.f32.mrb[63].mxu0  ;;  %1514 = vmax.xlane.f32.xlu1 %v1485_v16 }
 0x176   : > { %v1366_v49 = vadd.f32 %v2066_v44, %v2620_v9  ;;  %v2069_v50 = vadd.f32 %v2068_v47, %v2067_v53  ;;  %v2132_v51 = vpop.f32.mrb[63].mxu1 }
 0x177   : > { %v2133_v54 = vadd.f32 %v2132_v51, %v2131_v45 }
 0x178   : > { %v1369_v30 = vadd.f32 %v2069_v50, %v2623_v11  ;;  %v2714_v58 = vadd.f32 %v2130_v55, %v1366_v49 }
 0x17a   : > { %v1486_v60 = vsel %vm1471_vm0, %v2714_v58, -inf  ;;  %v2719_v61 = vadd.f32 %v2133_v54, %v1369_v30 }
 0x17b   : > { %1516 = vmax.xlane.f32.xlu0 %v1486_v60 }
 0x17c   : > { %v1487_v63 = vsel %vm1471_vm0, %v2719_v61, -inf }
 0x17d   : > { %1518 = vmax.xlane.f32.xlu1 %v1487_v63 }
 0x1d0   : > { %v1489_v9 = vpop.xlane.xlu0 %1488 }
 0x1d1   : > { %v2725_v1 = vsub.f32 %v2630_v31, %v1489_v9 }
 0x1d3   : > { %v1536_v11 = vmul.f32 1.442695, %v2725_v1 }
 0x1d4   : > { %v1491_v17 = vpop.xlane.xlu0 %1490 }
 0x1d5   : > { %2206 = vpow2.f32 %v1536_v11  ;;  %v2729_v3 = vsub.f32 %v2635_v36, %v1491_v17 }
 0x1d7   : > { %v1538_v19 = vmul.f32 1.442695, %v2729_v3 }
 0x1d8   : > { %v1493_v32 = vpop.xlane.xlu1 %1492 }
 0x1d9   : > { %2208 = vpow2.f32 %v1538_v19  ;;  %v2733_v4 = vsub.f32 %v2642_v52, %v1493_v32 }
 0x1db   : > { %v1540_v5 = vmul.f32 1.442695, %v2733_v4 }
 0x1dc   : > { %v1495_v6 = vpop.xlane.xlu1 %1494 }
 0x1dd   : > { %2210 = vpow2.f32 %v1540_v5  ;;  %v2737_v31 = vsub.f32 %v2647_v57, %v1495_v6 }
 0x1df   : > { %v2207_v7 = vpop.eup %2206  ;;  %v1542_v8 = vmul.f32 1.442695, %v2737_v31 }
 0x1e0   : > { %v1497_v12 = vpop.xlane.xlu0 %1496  ;;  %v1568_v36 = vsel %vm1471_vm0, %v2207_v7, 0.0 }
 0x1e1   : > { %2212 = vpow2.f32 %v1542_v8  ;;  %v2743_v46 = vsub.f32 %v2654_v10, %v1497_v12  ;;  %1584 = vadd.xlane.f32.xlu0 %v1568_v36 }
 0x1e2   : > { %v1499_v52 = vpop.xlane.xlu1 %1498 }
 0x1e3   : > { %v2209_v20 = vpop.eup %2208  ;;  %v1544_v22 = vmul.f32 1.442695, %v2743_v46  ;;  %v2747_v23 = vsub.f32 %v2659_v15, %v1499_v52 }
 0x1e4   : > { %v1569_v57 = vsel %vm1471_vm0, %v2209_v20, 0.0 }
 0x1e5   : > { %2214 = vpow2.f32 %v1544_v22  ;;  %v1546_v24 = vmul.f32 1.442695, %v2747_v23  ;;  %1586 = vadd.xlane.f32.xlu1 %v1569_v57 }
 0x1e7   : > { %v2211_v48 = vpop.eup %2210  ;;  %2216 = vpow2.f32 %v1546_v24 }
 0x1e8   : > { %v1501_v35 = vpop.xlane.xlu0 %1500  ;;  %v1570_v10 = vsel %vm1471_vm0, %v2211_v48, 0.0 }
 0x1e9   : > { %v2755_v25 = vsub.f32 %v2666_v34, %v1501_v35  ;;  %1588 = vadd.xlane.f32.xlu0 %v1570_v10 }
 0x1ea   : > { %v1503_v37 = vpop.xlane.xlu1 %1502 }
 0x1eb   : > { %v2213_v15 = vpop.eup %2212  ;;  %v1548_v26 = vmul.f32 1.442695, %v2755_v25  ;;  %v2759_v27 = vsub.f32 %v2671_v14, %v1503_v37 }
 0x1ec   : > { %v1571_v28 = vsel %vm1471_vm0, %v2213_v15, 0.0 }
 0x1ed   : > { %2218 = vpow2.f32 %v1548_v26  ;;  %v1550_v29 = vmul.f32 1.442695, %v2759_v27  ;;  %1590 = vadd.xlane.f32.xlu1 %v1571_v28 }
 0x1ef   : > { %v2215_v2 = vpop.eup %2214  ;;  %2220 = vpow2.f32 %v1550_v29 }
 0x1f0   : > { %v1505_v33 = vpop.xlane.xlu0 %1504  ;;  %v1572_v34 = vsel %vm1471_vm0, %v2215_v2, 0.0 }
 0x1f1   : > { %v2217_v38 = vpop.eup %2216  ;;  %v2767_v40 = vsub.f32 %v2678_v56, %v1505_v33  ;;  %1592 = vadd.xlane.f32.xlu0 %v1572_v34 }
 0x1f2   : > { %v1507_v14 = vpop.xlane.xlu1 %1506  ;;  %v1573_v41 = vsel %vm1471_vm0, %v2217_v38, 0.0 }
 0x1f3   : > { %v1552_v43 = vmul.f32 1.442695, %v2767_v40  ;;  %v2773_v62 = vsub.f32 %v2683_v59, %v1507_v14  ;;  %1594 = vadd.xlane.f32.xlu1 %v1573_v41 }
 0x1f5   : > { %2222 = vpow2.f32 %v1552_v43  ;;  %v1554_v44 = vmul.f32 1.442695, %v2773_v62 }
 0x1f7   : > { %v2219_v0 = vpop.eup %2218  ;;  %2224 = vpow2.f32 %v1554_v44 }
 0x1f8   : > { %v1509_v53 = vpop.xlane.xlu0 %1508  ;;  %v1574_v56 = vsel %vm1471_vm0, %v2219_v0, 0.0 }
 0x1f9   : > { %v2221_v16 = vpop.eup %2220  ;;  %v2779_v55 = vsub.f32 %v2690_v13, %v1509_v53  ;;  %1596 = vadd.xlane.f32.xlu0 %v1574_v56 }
 0x1fa   : > { %v1511_v45 = vpop.xlane.xlu1 %1510  ;;  %v1575_v59 = vsel %vm1471_vm0, %v2221_v16, 0.0 }
 0x1fb   : > { %v1556_v47 = vmul.f32 1.442695, %v2779_v55  ;;  %v2785_v49 = vsub.f32 %v2695_v21, %v1511_v45  ;;  %1598 = vadd.xlane.f32.xlu1 %v1575_v59 }
 0x1fd   : > { %2226 = vpow2.f32 %v1556_v47  ;;  %v1558_v50 = vmul.f32 1.442695, %v2785_v49 }
 0x1ff   : > { %v2223_v51 = vpop.eup %2222  ;;  %2228 = vpow2.f32 %v1558_v50 }
 0x200   : > { %v1513_v54 = vpop.xlane.xlu0 %1512  ;;  %v1576_v13 = vsel %vm1471_vm0, %v2223_v51, 0.0 }
 0x201   : > { %v2225_v30 = vpop.eup %2224  ;;  %v2791_v60 = vsub.f32 %v2702_v39, %v1513_v54  ;;  %1600 = vadd.xlane.f32.xlu0 %v1576_v13 }
 0x202   : > { %v1515_v63 = vpop.xlane.xlu1 %1514  ;;  %v1577_v21 = vsel %vm1471_vm0, %v2225_v30, 0.0 }
 0x203   : > { %v1560_v9 = vmul.f32 1.442695, %v2791_v60  ;;  %v2797_v11 = vsub.f32 %v2707_v42, %v1515_v63  ;;  %1602 = vadd.xlane.f32.xlu1 %v1577_v21 }
 0x205   : > { %2230 = vpow2.f32 %v1560_v9  ;;  %v1562_v17 = vmul.f32 1.442695, %v2797_v11 }
 0x207   : > { %v2227_v19 = vpop.eup %2226  ;;  %2232 = vpow2.f32 %v1562_v17 }
 0x208   : > { %v1517_v32 = vpop.xlane.xlu0 %1516  ;;  %v1578_v39 = vsel %vm1471_vm0, %v2227_v19, 0.0 }
 0x209   : > { %v2229_v5 = vpop.eup %2228  ;;  %v2803_v6 = vsub.f32 %v2714_v58, %v1517_v32  ;;  %1604 = vadd.xlane.f32.xlu0 %v1578_v39 }
 0x20a   : > { %v1519_v7 = vpop.xlane.xlu1 %1518  ;;  %v1579_v42 = vsel %vm1471_vm0, %v2229_v5, 0.0 }
 0x20b   : > { %v1564_v8 = vmul.f32 1.442695, %v2803_v6  ;;  %v2809_v12 = vsub.f32 %v2719_v61, %v1519_v7  ;;  %1606 = vadd.xlane.f32.xlu1 %v1579_v42 }
 0x20d   : > { %2234 = vpow2.f32 %v1564_v8  ;;  %v1566_v36 = vmul.f32 1.442695, %v2809_v12 }
 0x20f   : > { %v2231_v52 = vpop.eup %2230  ;;  %2236 = vpow2.f32 %v1566_v36 }
 0x210   : > { %v1580_v58 = vsel %vm1471_vm0, %v2231_v52, 0.0 }
 0x211   : > { %v2233_v20 = vpop.eup %2232  ;;  %1608 = vadd.xlane.f32.xlu0 %v1580_v58 }
 0x212   : > { %v1581_v22 = vsel %vm1471_vm0, %v2233_v20, 0.0 }
 0x213   : > { %1610 = vadd.xlane.f32.xlu1 %v1581_v22 }
 0x217   : > { %v2235_v57 = vpop.eup %2234 }
 0x218   : > { %v1582_v61 = vsel %vm1471_vm0, %v2235_v57, 0.0 }
 0x219   : > { %v2237_v24 = vpop.eup %2236  ;;  %1612 = vadd.xlane.f32.xlu0 %v1582_v61 }
 0x21a   : > { %v1583_v48 = vsel %vm1471_vm0, %v2237_v24, 0.0 }
 0x21b   : > { %1614 = vadd.xlane.f32.xlu1 %v1583_v48 }
 0x26e   : > { %v1585_v35 = vpop.xlane.xlu0 %1584 }
 0x26f   : > { %2238 = vlog2.f32 %v1585_v35 }
 0x272   : > { %v1587_v10 = vpop.xlane.xlu1 %1586 }
 0x273   : > { %2240 = vlog2.f32 %v1587_v10 }
 0x276   : > { %v1589_v37 = vpop.xlane.xlu0 %1588 }
 0x277   : > { %2242 = vlog2.f32 %v1589_v37 }
 0x279   : > { %v2239_v15 = vpop.eup %2238 }
 0x27a   : > { %v1617_v26 = vmul.f32 0.6931472, %v2239_v15  ;;  %v1591_v28 = vpop.xlane.xlu1 %1590 }
 0x27b   : > { %2244 = vlog2.f32 %v1591_v28 }
 0x27c   : > { %v1648_v18 = vsub.f32 %v2725_v1, %v1617_v26 }
 0x27d   : > { %v2241_v29 = vpop.eup %2240 }
 0x27e   : > { %1664 = vst [vmem:[%s2824_s29] sm:$0xff] %v1648_v18  ;;  %v1619_v2 = vmul.f32 0.6931472, %v2241_v29  ;;  %v1593_v33 = vpop.xlane.xlu0 %1592 }
 0x27f   : > { %2246 = vlog2.f32 %v1593_v33 }
 0x280   : > { %v1649_v34 = vsub.f32 %v2729_v3, %v1619_v2  ;;  %v1595_v38 = vpop.xlane.xlu1 %1594 }
 0x281   : > { %v2243_v14 = vpop.eup %2242  ;;  %2248 = vlog2.f32 %v1595_v38 }
 0x282   : > { %1665 = vst [vmem:[%s2824_s29 + $0x8] sm:$0xff] %v1649_v34  ;;  %v1621_v41 = vmul.f32 0.6931472, %v2243_v14 }
 0x284   : > { %v1650_v43 = vsub.f32 %v2733_v4, %v1621_v41 }
 0x285   : > { %v2245_v44 = vpop.eup %2244 }
 0x286   : > { %1666 = vst [vmem:[%s2824_s29 + $0x10] sm:$0xff] %v1650_v43  ;;  %v1623_v0 = vmul.f32 0.6931472, %v2245_v44  ;;  %v1597_v1 = vpop.xlane.xlu0 %1596 }
 0x287   : > { %2250 = vlog2.f32 %v1597_v1 }
 0x288   : > { %v1651_v53 = vsub.f32 %v2737_v31, %v1623_v0  ;;  %v1599_v56 = vpop.xlane.xlu1 %1598 }
 0x289   : > { %v2247_v16 = vpop.eup %2246  ;;  %2252 = vlog2.f32 %v1599_v56 }
 0x28a   : > { %1667 = vst [vmem:[%s2824_s29 + $0x18] sm:$0xff] %v1651_v53  ;;  %v1625_v3 = vmul.f32 0.6931472, %v2247_v16 }
 0x28b   : > { %v2249_v45 = vpop.eup %2248 }
 0x28c   : > { %v1652_v59 = vsub.f32 %v2743_v46, %v1625_v3  ;;  %v1627_v47 = vmul.f32 0.6931472, %v2249_v45 }
 0x28e   : > { %1668 = vst [vmem:[%s2824_s29 + $0x20] sm:$0xff] %v1652_v59  ;;  %v1653_v4 = vsub.f32 %v2747_v23, %v1627_v47  ;;  %v1601_v50 = vpop.xlane.xlu0 %1600 }
 0x28f   : > { %2254 = vlog2.f32 %v1601_v50 }
 0x290   : > { %1669 = vst [vmem:[%s2824_s29 + $0x28] sm:$0xff] %v1653_v4  ;;  %v1603_v51 = vpop.xlane.xlu1 %1602 }
 0x291   : > { %v2251_v54 = vpop.eup %2250  ;;  %2256 = vlog2.f32 %v1603_v51 }
 0x292   : > { %v1629_v31 = vmul.f32 0.6931472, %v2251_v54 }
 0x293   : > { %v2253_v13 = vpop.eup %2252 }
 0x294   : > { %v1654_v30 = vsub.f32 %v2755_v25, %v1629_v31  ;;  %v1631_v63 = vmul.f32 0.6931472, %v2253_v13 }
 0x296   : > { %1670 = vst [vmem:[%s2824_s29 + $0x30] sm:$0xff] %v1654_v30  ;;  %v1655_v46 = vsub.f32 %v2759_v27, %v1631_v63  ;;  %v1605_v21 = vpop.xlane.xlu0 %1604 }
 0x297   : > { %2258 = vlog2.f32 %v1605_v21 }
 0x298   : > { %1671 = vst [vmem:[%s2824_s29 + $0x38] sm:$0xff] %v1655_v46  ;;  %v1607_v23 = vpop.xlane.xlu1 %1606 }
 0x299   : > { %v2255_v9 = vpop.eup %2254  ;;  %2260 = vlog2.f32 %v1607_v23 }
 0x29a   : > { %v1633_v17 = vmul.f32 0.6931472, %v2255_v9 }
 0x29b   : > { %v2257_v19 = vpop.eup %2256 }
 0x29c   : > { %v1656_v32 = vsub.f32 %v2767_v40, %v1633_v17  ;;  %v1635_v39 = vmul.f32 0.6931472, %v2257_v19 }
 0x29e   : > { %1672 = vst [vmem:[%s2824_s29 + $0x40] sm:$0xff] %v1656_v32  ;;  %v1657_v25 = vsub.f32 %v2773_v62, %v1635_v39  ;;  %v1609_v5 = vpop.xlane.xlu0 %1608 }
 0x29f   : > { %2262 = vlog2.f32 %v1609_v5 }
 0x2a0   : > { %1673 = vst [vmem:[%s2824_s29 + $0x48] sm:$0xff] %v1657_v25  ;;  %v1611_v27 = vpop.xlane.xlu1 %1610 }
 0x2a1   : > { %v2259_v7 = vpop.eup %2258  ;;  %2264 = vlog2.f32 %v1611_v27 }
 0x2a2   : > { %v1637_v42 = vmul.f32 0.6931472, %v2259_v7 }
 0x2a3   : > { %v2261_v8 = vpop.eup %2260 }
 0x2a4   : > { %v1658_v36 = vsub.f32 %v2779_v55, %v1637_v42  ;;  %v1639_v52 = vmul.f32 0.6931472, %v2261_v8 }
 0x2a6   : > { %1674 = vst [vmem:[%s2824_s29 + $0x50] sm:$0xff] %v1658_v36  ;;  %v1659_v40 = vsub.f32 %v2785_v49, %v1639_v52  ;;  %v1613_v58 = vpop.xlane.xlu0 %1612 }
 0x2a7   : > { %2266 = vlog2.f32 %v1613_v58 }
 0x2a8   : > { %1675 = vst [vmem:[%s2824_s29 + $0x58] sm:$0xff] %v1659_v40  ;;  %v1615_v62 = vpop.xlane.xlu1 %1614 }
 0x2a9   : > { %v2263_v20 = vpop.eup %2262  ;;  %2268 = vlog2.f32 %v1615_v62 }
 0x2aa   : > { %v1641_v22 = vmul.f32 0.6931472, %v2263_v20 }
 0x2ab   : > { %v2265_v57 = vpop.eup %2264 }
 0x2ac   : > { %v1660_v61 = vsub.f32 %v2791_v60, %v1641_v22  ;;  %v1643_v24 = vmul.f32 0.6931472, %v2265_v57 }
 0x2ae   : > { %1676 = vst [vmem:[%s2824_s29 + $0x60] sm:$0xff] %v1660_v61  ;;  %v1661_v55 = vsub.f32 %v2797_v11, %v1643_v24 }
 0x2b0   : > { %1677 = vst [vmem:[%s2824_s29 + $0x68] sm:$0xff] %v1661_v55 }
 0x2b1   : > { %v2267_v48 = vpop.eup %2266 }
 0x2b2   : > { %v1645_v35 = vmul.f32 0.6931472, %v2267_v48 }
 0x2b3   : > { %v2269_v49 = vpop.eup %2268 }
 0x2b4   : > { %v1662_v10 = vsub.f32 %v2803_v6, %v1645_v35  ;;  %v1647_v37 = vmul.f32 0.6931472, %v2269_v49 }
 0x2b6   : > { %1678 = vst [vmem:[%s2824_s29 + $0x70] sm:$0xff] %v1662_v10  ;;  %v1663_v15 = vsub.f32 %v2809_v12, %v1647_v37 }
 0x2b8   : > { %1679 = vst [vmem:[%s2824_s29 + $0x78] sm:$0xff] %v1663_v15 }
 0x2b9 PF: > { %s13_s12 = sadd.s32 1, %s2276_s12  }
 0x2ba   : > { %p10_p4 = scmp.ge.s32.totalorder %s13_s12, 10  }
 0x2bc   :  { %12 = sbr.rel (!%p10_p4) target bundleno = 1 (0x1), region = 62 }

// kernel: gcn_forward.2
= control target key start
LH: loop header
LB: loop body
LE: loop exit
PB: predicated region body
PF: predicated region fallthrough
CT: control target
= control target key end

     0   :  { %9 = vsyncpa [#allocation3], 0  ;;  %s3172_s0 = inlined_call_operand.hbm [shape: bf16[1024,1024], index: 0, kind: input, shape index: {}]   ;;  %s3173_s1 = inlined_call_operand.vmem [shape: bf16[1024,128], index: 1, kind: input, shape index: {}]   ;;  %s3174_s2 = inlined_call_operand.hbm [shape: f32[1,128], index: 2, kind: input, shape index: {}]   ;;  %s3175_s3 = inlined_call_operand.vmem [shape: bf16[128,128], index: 3, kind: input, shape index: {}]   ;;  %s3176_s4 = inlined_call_operand.vmem [shape: bf16[1024,128], index: 4, kind: output, shape index: {}]  }
   0x1   :  { %11 = vsyncpa [#allocation3 + $0x1], 0 }
   0x2   :  { %12 = vsyncpa [#allocation5], 0  ;;  %s2673_s15 = smov 0   ;;  %s2675_s16 = smov 0  }
   0x3   :  { %s2677_s17 = smov 0   ;;  %s2679_s18 = smov 0  }
   0x4 LB: > { %s1868_s19 = sadd.s32 4294967295, %s2642_s18   ;;  %s2693_s20 = sadd.s32 1, %s2642_s18   ;;  %s2642_s18 = sphi %s2679_s18, %s3195_s18   ;;  %s2638_s17 = sphi %s2677_s17, %s3194_s17   ;;  %s2634_s16 = sphi %s2675_s16, %s3193_s16   ;;  %s2630_s15 = sphi %s2673_s15, %s3192_s15  }
   0x5   : > { %s22_s21 = ssub.s32 %s2642_s18, %s2693_s20  ;;  %s25_s22 = sadd.s32 1, %s2638_s17 }
   0x6   : > { %p23_p0 = scmp.eq.s32.totalorder %s22_s21, 0  ;;  %p32_p1 = scmp.ne.s32.totalorder %s2638_s17, %s2634_s16 }
   0x7   : > { %p33_p2 = scmp.eq.s32.totalorder %s2642_s18, 0  ;;  %p38_p3 = scmp.ne.s32.totalorder %s2634_s16, %s2630_s15 }
   0x8   : > { %s2703_s23 = scalar_select %p23_p0, %s2638_s17, %s25_s22  }
   0x9   : > { %p2705_p4 = por %p33_p2, %p32_p1  ;;  %p2711_p5 = scmp.eq.s32.totalorder %s1868_s19, 0 }
   0xa   : > { %p1870_p6 = scmp.ge.s32.totalorder %s2642_s18, 1  ;;  %p138_p7 = scmp.lt.s32.totalorder %s2642_s18, 9 }
   0xb   : > { %s3183_s25 = scalar_select %p2711_p5, 1, 0 }
   0xc   : > { %p2719_p8 = por %p2711_p5, %p38_p3  ;;  %p2723_p9 = pnand %p1870_p6, %p138_p7 }
   0xd   : > { %s2644_s28 = smov [#allocation4]   ;;  %p2437_p11 = scmp.lt.s32.totalorder %s2642_s18, 8 }
   0xe   : > { %s3184_s26 = scalar_select %p2719_p8, 1, 0 }
   0xf   : > { %s3185_s27 = scalar_select %p2723_p9, 1, 0 }
  0x10   : > { %s154_s29 = sshll.u32 %s2644_s28, 4  ;;  %p2428_p10 = pneg %p2723_p9  ;;  %s155_s29 = int_to_ptr.vmem [resolvable:$true] %s154_s29 }
  0x11   : > { %s168_s30 = sand.u32 1, %s2638_s17   ;;  %p2739_p13 = pnand %p2437_p11, %p2705_p4 }
  0x12   : > { %p2733_p12 = pnand %p2428_p10, %p2711_p5  ;;  %s1873_s7 = sshll.u32 %s168_s30, 9 }
  0x13   : > { %s3187_s6 = scalar_select %p2739_p13, 1, 0 }
  0x14   : > { %s2546_s10 = scalar_lea.hbm %s3174_s2, 16  ;;  %p2548_p1 = pneg %p2733_p12 }
  0x15   : > { %p2547_p0 = scmp.ne.s32.totalorder %s3174_s2, %s2546_s10  ;;  %p2553_p4 = scmp.lt.u32.totalorder %s2546_s10, %s3174_s2 }
  0x17   : > { %p2549_p2 = pnand %p2548_p1, %p2547_p0 }
  0x19   : > { %p2550_p3 = pneg %p2549_p2 }
  0x1b   : > { %p2555_p6 = pnand %p2553_p4, %p2550_p3 }
  0x1d   : > { %2558 = shalt.err (!%p2555_p6)
}
  0x1e   : > { %s2559_s15 = scalar_lea.vmem %s155_s29, 16  ;;  %s2566_s21 = scalar_lea.vmem %s155_s29, 32 }
  0x1f   : > { %p2560_p7 = scmp.ne.s32.totalorder %s155_s29, %s2559_s15  ;;  %p2567_p5 = scmp.lt.s32.totalorder %s155_s29, %s155_s29 }
  0x20   : > { %p2568_p8 = scmp.lt.s32.totalorder %s2566_s21, %s2559_s15 }
  0x21   : > { %p2562_p10 = pnand %p2560_p7, %p2548_p1 }
  0x22   : > { %p2569_p9 = por %p2568_p8, %p2567_p5 }
  0x23   : > { %p2563_p11 = pneg %p2562_p10 }
  0x25   : > { %p2570_p13 = pnand %p2569_p9, %p2563_p11 }
  0x27   : > { %2573 = shalt.err (!%p2570_p13)
}
  0x28   : > { %2431 = dma.hbm_to_vmem [thread:$0]  (!%p2733_p12), %s3174_s2, 16, %s155_s29, [#allocation5]  }
  0x29   : > { %s2038_s28 = sshll.u32 %s2642_s18, 13  ;;  %s172_s11 = scalar_lea.vmem [#allocation2], %s1873_s7 }
  0x2a   : > { %s2763_s10 = scalar_lea.hbm %s3172_s0, %s2038_s28  ;;  %s180_s12 = sshll.u32 %s172_s11, 4  ;;  %s2765_s12 = int_to_ptr.vmem [resolvable:$true] %s180_s12 }
  0x2b   : > { %s2767_s5 = scalar_lea.sflag [#allocation3], %s168_s30  ;;  %s2574_s13 = scalar_lea.hbm %s2763_s10, 8192 }
  0x2c   : > { %p2575_p5 = scmp.ne.s32.totalorder %s2763_s10, %s2574_s13  ;;  %p3188_p8 = scmp.ne.s32.totalorder %s3187_s6, 0 }
  0x2d   : > { %s2579_s15 = scalar_lea.hbm %s3172_s0, 65536  ;;  %p2580_p0 = scmp.lt.u32.totalorder %s2763_s10, %s3172_s0 }
  0x2e   : > { %p2576_p9 = pneg %p3188_p8  ;;  %p2581_p1 = scmp.lt.u32.totalorder %s2579_s15, %s2574_s13 }
  0x2f   : > { %p2583_p3 = scmp.lt.u32.totalorder %s2574_s13, %s2763_s10 }
  0x30   : > { %p2577_p12 = pnand %p2576_p9, %p2575_p5  ;;  %p2582_p2 = por %p2581_p1, %p2580_p0 }
  0x32   : > { %p2578_p13 = pneg %p2577_p12  ;;  %p2584_p4 = por %p2583_p3, %p2582_p2 }
  0x34   : > { %p2585_p6 = pnand %p2584_p4, %p2578_p13 }
  0x36   : > { %2588 = shalt.err (!%p2585_p6)
}
  0x37   : > { %s2589_s30 = scalar_lea.vmem %s2765_s12, 8192  ;;  %s2645_s7 = smov [#allocation2]  }
  0x38   : > { %p2590_p7 = scmp.ne.s32.totalorder %s2765_s12, %s2589_s30  ;;  %s2594_s24 = sshll.u32 %s2645_s7, 4  ;;  %s2595_s24 = int_to_ptr.vmem [resolvable:$false] %s2594_s24 }
  0x39   : > { %s2596_s28 = scalar_lea.vmem %s2595_s24, 16384  ;;  %p2597_p5 = scmp.lt.s32.totalorder %s2765_s12, %s2595_s24 }
  0x3a   : > { %p2592_p10 = pnand %p2590_p7, %p2576_p9  ;;  %p2598_p12 = scmp.lt.s32.totalorder %s2596_s28, %s2589_s30 }
  0x3c   : > { %p2593_p11 = pneg %p2592_p10  ;;  %p2599_p0 = por %p2598_p12, %p2597_p5 }
  0x3e   : > { %p2600_p1 = pnand %p2599_p0, %p2593_p11 }
  0x40   : > { %2603 = shalt.err (!%p2600_p1)
}
  0x41   : > { %s2646_s8 = smov 512   ;;  %s2647_s9 = smov 32  }
  0x42   : > { %2435 = dma.hbm_to_vmem [thread:$0]  (!%p3188_p8), %s2763_s10, 8192, %s2765_s12, %s2767_s5, %s2646_s8, %s2646_s8, %s2647_s9  }
  0x43   : > { %p3189_p9 = scmp.ne.s32.totalorder %s3185_s27, 0 }
  0x44   : > { %s194_s11 = sand.u32 (!%p3189_p9), 1, %s2634_s16   ;;  %p3190_p13 = scmp.ne.s32.totalorder (!%p3189_p9), %s3184_s26, 0 }
  0x45   : > { %192 = sbr.rel (%p3189_p9) target bundleno = 677 (0x2a5), region = 36  ;;  %s1878_s13 = sshll.u32 (!%p3189_p9), %s194_s11, 9 }
  0x46   : > { %s195_s29 = scalar_lea.sflag (!%p3189_p9), [#allocation3], %s194_s11  ;;  %s2798_s14 = scalar_lea.vmem (!%p3189_p9), [#allocation2], %s1878_s13 }
  0x4c   : > { %2621 = dma.done.wait (%p3190_p13), %s195_s29, 8192  }
  0x4d   : > { %2623 = vsyncadd (%p3190_p13), %s195_s29, 4294959104  ;;  %p3191_p2 = scmp.ne.s32.totalorder %s3183_s25, 0 }
  0x4f   : > { %2625 = dma.done.wait (%p3191_p2), [#allocation5], 16  }
  0x50   : > { %2627 = vsyncadd (%p3191_p2), [#allocation5], 4294967280  ;;  %v2474_v0 = vld [vmem:[%s3173_s1 + $0x40] sm:$0xff]   ;;  %v2478_v4 = vld [vmem:[%s3173_s1 + $0x48] sm:$0xff]   ;;  %s1880_s30 = sshll.u32 %s1868_s19, 4 }
  0x51   : > { %v2475_v1 = vld [vmem:[%s3173_s1 + $0xc0] sm:$0xff]   ;;  %2102 = vmatprep.subr.bf16.mxu0 %v2474_v0  ;;  %v2479_v5 = vld [vmem:[%s3173_s1 + $0xc8] sm:$0xff]   ;;  %v2482_v8 = vld [vmem:[%s3173_s1 + $0x50] sm:$0xff]   ;;  %p229_p8 = scmp.lt.s32.totalorder %s1880_s30, 127 }
  0x52   : > { %v2476_v2 = vld [vmem:[%s3173_s1] sm:$0xff]   ;;  %2166 = vmatprep.subr.bf16.mxu1 %v2475_v1  ;;  %v2480_v6 = vld [vmem:[%s3173_s1 + $0x8] sm:$0xff]   ;;  %v2483_v9 = vld [vmem:[%s3173_s1 + $0xd0] sm:$0xff]  }
  0x53   : > { %v2477_v3 = vld [vmem:[%s3173_s1 + $0x80] sm:$0xff]   ;;  %2103 = vmatpush3.bf16.msra.mxu0 %v2476_v2  ;;  %v2481_v7 = vld [vmem:[%s3173_s1 + $0x88] sm:$0xff]   ;;  %v2484_v10 = vld [vmem:[%s3173_s1 + $0x10] sm:$0xff]   ;;  %s3197_s30 = smov (!%p229_p8, %s1880_s30), 127 }
  0x54   : > { %2167 = vmatpush3.bf16.msra.mxu1 %v2477_v3  ;;  %2104 = vmatprep.subr.bf16.mxu0 %v2478_v4  ;;  %v2485_v11 = vld [vmem:[%s3173_s1 + $0x90] sm:$0xff]   ;;  %v2486_v12 = vld [vmem:[%s3173_s1 + $0x58] sm:$0xff]   ;;  %v2490_v16 = vld [vmem:[%s3173_s1 + $0x60] sm:$0xff]   ;;  %s1881_s7 = sshll.u32 %s3197_s30, 2 }
  0x55   : > { %2168 = vmatprep.subr.bf16.mxu1 %v2479_v5  ;;  %v2487_v13 = vld [vmem:[%s3173_s1 + $0xd8] sm:$0xff]   ;;  %v2491_v17 = vld [vmem:[%s3173_s1 + $0xe0] sm:$0xff]   ;;  %v2494_v20 = vld [vmem:[%s3173_s1 + $0x68] sm:$0xff]   ;;  %s232_s8 = scalar_lea.vmem %s3176_s4, %s1881_s7 }
  0x56   : > { %v2488_v14 = vld [vmem:[%s3173_s1 + $0x18] sm:$0xff]   ;;  %v2492_v18 = vld [vmem:[%s3173_s1 + $0x20] sm:$0xff]   ;;  %v2495_v21 = vld [vmem:[%s3173_s1 + $0xe8] sm:$0xff]  }
  0x57   : > { %2105 = vmatpush3.bf16.msra.mxu0 %v2480_v6  ;;  %v2489_v15 = vld [vmem:[%s3173_s1 + $0x98] sm:$0xff]   ;;  %v2493_v19 = vld [vmem:[%s3173_s1 + $0xa0] sm:$0xff]   ;;  %v2496_v22 = vld [vmem:[%s3173_s1 + $0x28] sm:$0xff]  }
  0x58   : > { %2169 = vmatpush3.bf16.msra.mxu1 %v2481_v7  ;;  %2106 = vmatprep.subr.bf16.mxu0 %v2482_v8  ;;  %v2497_v23 = vld [vmem:[%s3173_s1 + $0xa8] sm:$0xff]   ;;  %v2498_v24 = vld [vmem:[%s3173_s1 + $0x70] sm:$0xff]   ;;  %v2502_v28 = vld [vmem:[%s3173_s1 + $0x78] sm:$0xff]  }
  0x59   : > { %2170 = vmatprep.subr.bf16.mxu1 %v2483_v9  ;;  %v2499_v25 = vld [vmem:[%s3173_s1 + $0xf0] sm:$0xff]   ;;  %v2503_v29 = vld [vmem:[%s3173_s1 + $0xf8] sm:$0xff]   ;;  %v235_v32 = vld [vmem:[%s2798_s14] sm:$0xff] }
  0x5a   : > { %v2500_v26 = vld [vmem:[%s3173_s1 + $0x30] sm:$0xff]   ;;  %v2504_v30 = vld [vmem:[%s3173_s1 + $0x38] sm:$0xff]   ;;  %v239_v33 = vld [vmem:[%s2798_s14 + $0x20] sm:$0xff] }
  0x5b   : > { %2107 = vmatpush3.bf16.msra.mxu0 %v2484_v10  ;;  %v2501_v27 = vld [vmem:[%s3173_s1 + $0xb0] sm:$0xff]   ;;  %v2505_v31 = vld [vmem:[%s3173_s1 + $0xb8] sm:$0xff]   ;;  %v236_v34 = vld [vmem:[%s2798_s14 + $0x8] sm:$0xff]  ;;  %v1883_v35 = vcombine.low %v235_v32, %v239_v33  ;;  %v1884_v36 = vcombine.high %v235_v32, %v239_v33 }
  0x5c   : > { %2171 = vmatpush3.bf16.msra.mxu1 %v2485_v11  ;;  %2108 = vmatprep.subr.bf16.mxu0 %v2486_v12  ;;  %v240_v37 = vld [vmem:[%s2798_s14 + $0x28] sm:$0xff]  ;;  %v2506_v40 = vld [vmem:[%s3173_s1 + $0x140] sm:$0xff]   ;;  %v2514_v62 = vld [vmem:[%s3173_s1 + $0x150] sm:$0xff]  }
  0x5d   : > { %2172 = vmatprep.subr.bf16.mxu1 %v2487_v13  ;;  %v1885_v38 = vcombine.low %v236_v34, %v240_v37  ;;  %v1886_v39 = vcombine.high %v236_v34, %v240_v37  ;;  %1170 = vmatprep.mubr.bf16.mxu0 %v1884_v36  ;;  %v2507_v41 = vld [vmem:[%s3173_s1 + $0x100] sm:$0xff]   ;;  %v244_v47 = vld [vmem:[%s2798_s14 + $0x48] sm:$0xff]  ;;  %v2515_v63 = vld [vmem:[%s3173_s1 + $0x110] sm:$0xff]  }
  0x5e   : > { %v2508_v42 = vld [vmem:[%s3173_s1 + $0x1c0] sm:$0xff]   ;;  %v248_v48 = vld [vmem:[%s2798_s14 + $0x68] sm:$0xff]  ;;  %v2516_v0 = vld [vmem:[%s3173_s1 + $0x1d0] sm:$0xff]  }
  0x5f   : > { %2109 = vmatpush3.bf16.msra.mxu0 %v2488_v14  ;;  %1267 = vmatprep.mubr.bf16.mxu1 %v1886_v39  ;;  %v2509_v43 = vld [vmem:[%s3173_s1 + $0x180] sm:$0xff]   ;;  %v1894_v49 = vcombine.high %v244_v47, %v248_v48  ;;  %v2510_v50 = vld [vmem:[%s3173_s1 + $0x148] sm:$0xff]   ;;  %v1893_v53 = vcombine.low %v244_v47, %v248_v48  ;;  %v2517_v1 = vld [vmem:[%s3173_s1 + $0x190] sm:$0xff]  }
  0x60   : > { %2173 = vmatpush3.bf16.msra.mxu1 %v2489_v15  ;;  %2110 = vmatprep.subr.bf16.mxu0 %v2490_v16  ;;  %v243_v44 = vld [vmem:[%s2798_s14 + $0x40] sm:$0xff]  ;;  %v2511_v52 = vld [vmem:[%s3173_s1 + $0x108] sm:$0xff]   ;;  %v2518_v10 = vld [vmem:[%s3173_s1 + $0x158] sm:$0xff]  }
  0x61   : > { %2174 = vmatprep.subr.bf16.mxu1 %v2491_v17  ;;  %v247_v45 = vld [vmem:[%s2798_s14 + $0x60] sm:$0xff]  ;;  %v2512_v54 = vld [vmem:[%s3173_s1 + $0x1c8] sm:$0xff]   ;;  %v2519_v11 = vld [vmem:[%s3173_s1 + $0x118] sm:$0xff]  }
  0x62   : > { %v1892_v46 = vcombine.high %v243_v44, %v247_v45  ;;  %v1891_v51 = vcombine.low %v243_v44, %v247_v45  ;;  %v2513_v55 = vld [vmem:[%s3173_s1 + $0x188] sm:$0xff]   ;;  %v251_v56 = vld [vmem:[%s2798_s14 + $0x80] sm:$0xff]  ;;  %v2520_v12 = vld [vmem:[%s3173_s1 + $0x1d8] sm:$0xff]  }
  0x63   : > { %2111 = vmatpush3.bf16.msra.mxu0 %v2492_v18  ;;  %v255_v57 = vld [vmem:[%s2798_s14 + $0xa0] sm:$0xff]  ;;  %v252_v58 = vld [vmem:[%s2798_s14 + $0x88] sm:$0xff]  ;;  %v2521_v13 = vld [vmem:[%s3173_s1 + $0x198] sm:$0xff]  }
  0x64   : > { %2175 = vmatpush3.bf16.msra.mxu1 %v2493_v19  ;;  %2112 = vmatprep.subr.bf16.mxu0 %v2494_v20  ;;  %v256_v59 = vld [vmem:[%s2798_s14 + $0xa8] sm:$0xff]  ;;  %v1900_v60 = vcombine.high %v251_v56, %v255_v57  ;;  %v1899_v2 = vcombine.low %v251_v56, %v255_v57  ;;  %v259_v3 = vld [vmem:[%s2798_s14 + $0xc0] sm:$0xff]  ;;  %v2531_v39 = vld [vmem:[%s3173_s1 + $0x130] sm:$0xff]  }
  0x65   : > { %2176 = vmatprep.subr.bf16.mxu1 %v2495_v21  ;;  %v1902_v61 = vcombine.high %v252_v58, %v256_v59  ;;  %v263_v4 = vld [vmem:[%s2798_s14 + $0xe0] sm:$0xff]  ;;  %v260_v5 = vld [vmem:[%s2798_s14 + $0xc8] sm:$0xff]  ;;  %v1901_v6 = vcombine.low %v252_v58, %v256_v59  ;;  %v2535_v48 = vld [vmem:[%s3173_s1 + $0x138] sm:$0xff]  }
  0x66   : > { %v1908_v7 = vcombine.high %v259_v3, %v263_v4  ;;  %v264_v8 = vld [vmem:[%s2798_s14 + $0xe8] sm:$0xff]  ;;  %v267_v14 = vld [vmem:[%s2798_s14 + $0x100] sm:$0xff]  ;;  %v1907_v19 = vcombine.low %v259_v3, %v263_v4 }
  0x67   : > { %2113 = vmatpush3.bf16.msra.mxu0 %v2496_v22  ;;  %v1910_v9 = vcombine.high %v260_v5, %v264_v8  ;;  %v271_v15 = vld [vmem:[%s2798_s14 + $0x120] sm:$0xff]  ;;  %v268_v16 = vld [vmem:[%s2798_s14 + $0x108] sm:$0xff]  ;;  %v1909_v21 = vcombine.low %v260_v5, %v264_v8  ;;  %v246_v8 = vld [vmem:[%s2798_s14 + $0x58] sm:$0xff] }
  0x68   : > { %2177 = vmatpush3.bf16.msra.mxu1 %v2497_v23  ;;  %2114 = vmatprep.subr.bf16.mxu0 %v2498_v24  ;;  %v272_v17 = vld [vmem:[%s2798_s14 + $0x128] sm:$0xff]  ;;  %v2522_v18 = vld [vmem:[%s3173_s1 + $0x160] sm:$0xff]   ;;  %v1916_v22 = vcombine.high %v267_v14, %v271_v15  ;;  %v1915_v34 = vcombine.low %v267_v14, %v271_v15  ;;  %v253_v14 = vld [vmem:[%s2798_s14 + $0x90] sm:$0xff] }
  0x69   : > { %2178 = vmatprep.subr.bf16.mxu1 %v2499_v25  ;;  %v2523_v20 = vld [vmem:[%s3173_s1 + $0x120] sm:$0xff]   ;;  %v1918_v24 = vcombine.high %v268_v16, %v272_v17  ;;  %v2528_v32 = vld [vmem:[%s3173_s1 + $0x1e8] sm:$0xff]   ;;  %v257_v15 = vld [vmem:[%s2798_s14 + $0xb0] sm:$0xff] }
  0x6a   : > { %v2524_v23 = vld [vmem:[%s3173_s1 + $0x1e0] sm:$0xff]   ;;  %v2529_v33 = vld [vmem:[%s3173_s1 + $0x1a8] sm:$0xff]  }
  0x6b   : > { %2115 = vmatpush3.bf16.msra.mxu0 %v2500_v26  ;;  %v2525_v25 = vld [vmem:[%s3173_s1 + $0x1a0] sm:$0xff]   ;;  %v284_v44 = vld [vmem:[%s2798_s14 + $0x188] sm:$0xff] }
  0x6c   : > { %2179 = vmatpush3.bf16.msra.mxu1 %v2501_v27  ;;  %2116 = vmatprep.subr.bf16.mxu0 %v2502_v28  ;;  %v275_v26 = vld [vmem:[%s2798_s14 + $0x140] sm:$0xff]  ;;  %v2526_v28 = vld [vmem:[%s3173_s1 + $0x168] sm:$0xff]  }
  0x6d   : > { %2180 = vmatprep.subr.bf16.mxu1 %v2503_v29  ;;  %v279_v27 = vld [vmem:[%s2798_s14 + $0x160] sm:$0xff]  ;;  %v276_v29 = vld [vmem:[%s2798_s14 + $0x148] sm:$0xff] }
  0x6e   : > { %v1924_v36 = vcombine.high %v275_v26, %v279_v27  ;;  %v288_v45 = vld [vmem:[%s2798_s14 + $0x1a8] sm:$0xff]  ;;  %v1923_v47 = vcombine.low %v275_v26, %v279_v27  ;;  %v1903_v26 = vcombine.low %v253_v14, %v257_v15 }
  0x6f   : > { %2117 = vmatpush3.bf16.msra.mxu0 %v2504_v30  ;;  %v280_v30 = vld [vmem:[%s2798_s14 + $0x168] sm:$0xff]  ;;  %v1933_v59 = vcombine.low %v284_v44, %v288_v45 }
  0x70   : > { %2181 = vmatpush3.bf16.msra.mxu1 %v2505_v31  ;;  %2230 = vmatprep.subr.bf16.mxu0 %v2506_v40  ;;  %v2527_v31 = vld [vmem:[%s3173_s1 + $0x128] sm:$0xff]   ;;  %v1926_v37 = vcombine.high %v276_v29, %v280_v30  ;;  %v2532_v40 = vld [vmem:[%s3173_s1 + $0x1f0] sm:$0xff]  }
  0x71   : > { %2294 = vmatprep.subr.bf16.mxu1 %v2508_v42  ;;  %v287_v42 = vld [vmem:[%s2798_s14 + $0x1a0] sm:$0xff]  ;;  %v292_v56 = vld [vmem:[%s2798_s14 + $0x1c8] sm:$0xff] }
  0x72   : > { %1171 = vmatmul.mubr.bf16.vlgmr.msra.gmra.mrb[0].mxu0 %v1883_v35  ;;  %v1917_v35 = vcombine.low %v268_v16, %v272_v17  ;;  %v296_v57 = vld [vmem:[%s2798_s14 + $0x1e8] sm:$0xff]  ;;  %v254_v16 = vld [vmem:[%s2798_s14 + $0x98] sm:$0xff] }
  0x73   : > { %1268 = vmatmul.mubr.bf16.vlgmr.msra.gmra.mrb[0].mxu1 %v1885_v38  ;;  %2231 = vmatpush3.bf16.msra.mxu0 %v2507_v41  ;;  %v2530_v38 = vld [vmem:[%s3173_s1 + $0x170] sm:$0xff]   ;;  %v283_v41 = vld [vmem:[%s2798_s14 + $0x180] sm:$0xff]  ;;  %v1941_v3 = vcombine.low %v292_v56, %v296_v57  ;;  %v258_v17 = vld [vmem:[%s2798_s14 + $0xb8] sm:$0xff] }
  0x74   : > { %2295 = vmatpush3.bf16.msra.mxu1 %v2509_v43  ;;  %1178 = vmatprep.mubr.bf16.mxu0 %v1892_v46  ;;  %v2533_v43 = vld [vmem:[%s3173_s1 + $0x1b0] sm:$0xff]   ;;  %v2534_v46 = vld [vmem:[%s3173_s1 + $0x178] sm:$0xff]   ;;  %v1931_v58 = vcombine.low %v283_v41, %v287_v42  ;;  %v1905_v27 = vcombine.low %v254_v16, %v258_v17 }
  0x75   : > { %1275 = vmatprep.mubr.bf16.mxu1 %v1894_v49  ;;  %2232 = vmatprep.subr.bf16.mxu0 %v2510_v50  ;;  %v1925_v49 = vcombine.low %v276_v29, %v280_v30  ;;  %v1932_v50 = vcombine.high %v283_v41, %v287_v42  ;;  %v269_v30 = vld [vmem:[%s2798_s14 + $0x110] sm:$0xff]  ;;  %v282_v41 = vld [vmem:[%s2798_s14 + $0x178] sm:$0xff] }
  0x76   : > { %2296 = vmatprep.subr.bf16.mxu1 %v2512_v54  ;;  %v291_v54 = vld [vmem:[%s2798_s14 + $0x1c0] sm:$0xff] }
  0x77   : > { %2233 = vmatpush3.bf16.msra.mxu0 %v2511_v52  ;;  %v1934_v52 = vcombine.high %v284_v44, %v288_v45 }
  0x78   : > { %2297 = vmatpush3.bf16.msra.mxu1 %v2513_v55  ;;  %2234 = vmatprep.subr.bf16.mxu0 %v2514_v62  ;;  %v295_v55 = vld [vmem:[%s2798_s14 + $0x1e0] sm:$0xff]  ;;  %v237_v62 = vld [vmem:[%s2798_s14 + $0x10] sm:$0xff] }
  0x79   : > { %2298 = vmatprep.subr.bf16.mxu1 %v2516_v0  ;;  %v238_v0 = vld [vmem:[%s2798_s14 + $0x18] sm:$0xff] }
  0x7a   : > { %1179 = vmatmul.mubr.bf16.gmra.mrb[4].mxu0 %v1891_v51  ;;  %v2536_v51 = vld [vmem:[%s3173_s1 + $0x1f8] sm:$0xff]  }
  0x7b   : > { %1276 = vmatmul.mubr.bf16.gmra.mrb[4].mxu1 %v1893_v53  ;;  %1186 = vmatprep.mubr.bf16.mxu0 %v1900_v60  ;;  %v2537_v53 = vld [vmem:[%s3173_s1 + $0x1b8] sm:$0xff]   ;;  %v1940_v60 = vcombine.high %v291_v54, %v295_v55 }
  0x7c   : > { %1283 = vmatprep.mubr.bf16.mxu1 %v1902_v61  ;;  %2235 = vmatpush3.bf16.msra.mxu0 %v2515_v63  ;;  %v1942_v61 = vcombine.high %v292_v56, %v296_v57  ;;  %v241_v63 = vld [vmem:[%s2798_s14 + $0x30] sm:$0xff]  ;;  %v294_v56 = vld [vmem:[%s2798_s14 + $0x1d8] sm:$0xff] }
  0x7d   : > { %2299 = vmatpush3.bf16.msra.mxu1 %v2517_v1  ;;  %2236 = vmatprep.subr.bf16.mxu0 %v2518_v10  ;;  %v242_v1 = vld [vmem:[%s2798_s14 + $0x38] sm:$0xff]  ;;  %v1888_v4 = vcombine.high %v237_v62, %v241_v63  ;;  %v1887_v10 = vcombine.low %v237_v62, %v241_v63 }
  0x7e   : > { %2300 = vmatprep.subr.bf16.mxu1 %v2520_v12  ;;  %v1890_v5 = vcombine.high %v238_v0, %v242_v1  ;;  %v298_v57 = vld [vmem:[%s2798_s14 + $0x1f8] sm:$0xff] }
  0x7f   : > { %v1945_v63 = vcombine.low %v294_v56, %v298_v57 }
  0x80   : > { %2237 = vmatpush3.bf16.msra.mxu0 %v2519_v11  ;;  %v1889_v11 = vcombine.low %v238_v0, %v242_v1  ;;  %v2538_v0 = vld [vmem:[%s3175_s3] sm:$0xff]   ;;  %v2539_v1 = vld [vmem:[%s3175_s3 + $0x8] sm:$0xff]  }
  0x81   : > { %2301 = vmatpush3.bf16.msra.mxu1 %v2521_v13  ;;  %2238 = vmatprep.subr.bf16.mxu0 %v2522_v18 }
  0x82   : > { %1187 = vmatmul.mubr.bf16.gmra.mrb[8].mxu0 %v1899_v2  ;;  %2302 = vmatprep.subr.bf16.mxu1 %v2524_v23  ;;  %v1939_v2 = vcombine.low %v291_v54, %v295_v55  ;;  %v265_v23 = vld [vmem:[%s2798_s14 + $0xf0] sm:$0xff] }
  0x83   : > { %1284 = vmatmul.mubr.bf16.gmra.mrb[8].mxu1 %v1901_v6  ;;  %1194 = vmatprep.mubr.bf16.mxu0 %v1908_v7  ;;  %v245_v6 = vld [vmem:[%s2798_s14 + $0x50] sm:$0xff] }
  0x84   : > { %1291 = vmatprep.mubr.bf16.mxu1 %v1910_v9  ;;  %2239 = vmatpush3.bf16.msra.mxu0 %v2523_v20  ;;  %v249_v7 = vld [vmem:[%s2798_s14 + $0x70] sm:$0xff]  ;;  %v250_v9 = vld [vmem:[%s2798_s14 + $0x78] sm:$0xff]  ;;  %v1904_v20 = vcombine.high %v253_v14, %v257_v15 }
  0x85   : > { %2303 = vmatpush3.bf16.msra.mxu1 %v2525_v25  ;;  %2240 = vmatprep.subr.bf16.mxu0 %v2526_v28  ;;  %v1896_v12 = vcombine.high %v245_v6, %v249_v7  ;;  %v1898_v13 = vcombine.high %v246_v8, %v250_v9  ;;  %v1895_v18 = vcombine.low %v245_v6, %v249_v7  ;;  %v266_v25 = vld [vmem:[%s2798_s14 + $0xf8] sm:$0xff]  ;;  %v293_v54 = vld [vmem:[%s2798_s14 + $0x1d0] sm:$0xff] }
  0x86   : > { %2304 = vmatprep.subr.bf16.mxu1 %v2528_v32  ;;  %v270_v32 = vld [vmem:[%s2798_s14 + $0x118] sm:$0xff]  ;;  %v297_v55 = vld [vmem:[%s2798_s14 + $0x1f0] sm:$0xff] }
  0x87   : > { %v1943_v62 = vcombine.low %v293_v54, %v297_v55  ;;  %v2544_v6 = vld [vmem:[%s3175_s3 + $0x30] sm:$0xff]   ;;  %v2545_v7 = vld [vmem:[%s3175_s3 + $0x38] sm:$0xff]  }
  0x88   : > { %2241 = vmatpush3.bf16.msra.mxu0 %v2527_v31  ;;  %v273_v31 = vld [vmem:[%s2798_s14 + $0x130] sm:$0xff] }
  0x89   : > { %2305 = vmatpush3.bf16.msra.mxu1 %v2529_v33  ;;  %2242 = vmatprep.subr.bf16.mxu0 %v2530_v38  ;;  %v274_v33 = vld [vmem:[%s2798_s14 + $0x138] sm:$0xff]  ;;  %v277_v38 = vld [vmem:[%s2798_s14 + $0x150] sm:$0xff]  ;;  %v1919_v42 = vcombine.low %v269_v30, %v273_v31 }
  0x8a   : > { %1195 = vmatmul.mubr.bf16.gmra.mrb[12].mxu0 %v1907_v19  ;;  %2306 = vmatprep.subr.bf16.mxu1 %v2532_v40  ;;  %v1897_v19 = vcombine.low %v246_v8, %v250_v9  ;;  %v278_v40 = vld [vmem:[%s2798_s14 + $0x158] sm:$0xff] }
  0x8b   : > { %1292 = vmatmul.mubr.bf16.gmra.mrb[12].mxu1 %v1909_v21  ;;  %1202 = vmatprep.mubr.bf16.mxu0 %v1916_v22  ;;  %v1906_v21 = vcombine.high %v254_v16, %v258_v17  ;;  %v261_v22 = vld [vmem:[%s2798_s14 + $0xd0] sm:$0xff]  ;;  %v1930_v45 = vcombine.high %v278_v40, %v282_v41 }
  0x8c   : > { %1299 = vmatprep.mubr.bf16.mxu1 %v1918_v24  ;;  %2243 = vmatpush3.bf16.msra.mxu0 %v2531_v39  ;;  %v262_v24 = vld [vmem:[%s2798_s14 + $0xd8] sm:$0xff]  ;;  %v1912_v28 = vcombine.high %v261_v22, %v265_v23  ;;  %v281_v39 = vld [vmem:[%s2798_s14 + $0x170] sm:$0xff] }
  0x8d   : > { %2307 = vmatpush3.bf16.msra.mxu1 %v2533_v43  ;;  %2244 = vmatprep.subr.bf16.mxu0 %v2534_v46  ;;  %v1914_v29 = vcombine.high %v262_v24, %v266_v25  ;;  %v1921_v43 = vcombine.low %v270_v32, %v274_v33  ;;  %v1928_v44 = vcombine.high %v277_v38, %v281_v39  ;;  %v285_v46 = vld [vmem:[%s2798_s14 + $0x190] sm:$0xff] }
  0x8e   : > { %2308 = vmatprep.subr.bf16.mxu1 %v2536_v51  ;;  %v1929_v51 = vcombine.low %v278_v40, %v282_v41 }
  0x90   : > { %2245 = vmatpush3.bf16.msra.mxu0 %v2535_v48  ;;  %v286_v48 = vld [vmem:[%s2798_s14 + $0x198] sm:$0xff] }
  0x91   : > { %2309 = vmatpush3.bf16.msra.mxu1 %v2537_v53  ;;  %2374 = vmatprep.subr.bf16.mxu0 %v2538_v0 }
  0x92   : > { %1203 = vmatmul.mubr.bf16.gmra.mrb[16].mxu0 %v1915_v34  ;;  %v1911_v34 = vcombine.low %v261_v22, %v265_v23  ;;  %2406 = vmatprep.subr.bf16.mxu1 %v2538_v0 }
  0x93   : > { %1300 = vmatmul.mubr.bf16.gmra.mrb[16].mxu1 %v1917_v35  ;;  %1210 = vmatprep.mubr.bf16.mxu0 %v1924_v36  ;;  %v1913_v35 = vcombine.low %v262_v24, %v266_v25  ;;  %v1920_v36 = vcombine.high %v269_v30, %v273_v31 }
  0x94   : > { %1307 = vmatprep.mubr.bf16.mxu1 %v1926_v37  ;;  %v1922_v37 = vcombine.high %v270_v32, %v274_v33 }
  0x9a   : > { %1211 = vmatmul.mubr.bf16.gmra.mrb[20].mxu0 %v1923_v47  ;;  %v289_v47 = vld [vmem:[%s2798_s14 + $0x1b0] sm:$0xff] }
  0x9b   : > { %1308 = vmatmul.mubr.bf16.gmra.mrb[20].mxu1 %v1925_v49  ;;  %1218 = vmatprep.mubr.bf16.mxu0 %v1932_v50  ;;  %v290_v49 = vld [vmem:[%s2798_s14 + $0x1b8] sm:$0xff]  ;;  %v1927_v50 = vcombine.low %v277_v38, %v281_v39 }
  0x9c   : > { %1315 = vmatprep.mubr.bf16.mxu1 %v1934_v52  ;;  %v1936_v52 = vcombine.high %v285_v46, %v289_v47  ;;  %v1938_v53 = vcombine.high %v286_v48, %v290_v49 }
  0xa2   : > { %1219 = vmatmul.mubr.bf16.gmra.mrb[24].mxu0 %v1931_v58  ;;  %v1935_v58 = vcombine.low %v285_v46, %v289_v47 }
  0xa3   : > { %1316 = vmatmul.mubr.bf16.gmra.mrb[24].mxu1 %v1933_v59  ;;  %1226 = vmatprep.mubr.bf16.mxu0 %v1940_v60  ;;  %v1937_v59 = vcombine.low %v286_v48, %v290_v49  ;;  %v1944_v60 = vcombine.high %v293_v54, %v297_v55 }
  0xa4   : > { %1323 = vmatprep.mubr.bf16.mxu1 %v1942_v61  ;;  %v1946_v61 = vcombine.high %v294_v56, %v298_v57 }
  0xaa   : > { %1227 = vmatmul.mubr.bf16.gmra.mrb[28].mxu0 %v1939_v2  ;;  %v2540_v2 = vld [vmem:[%s3175_s3 + $0x10] sm:$0xff]  }
  0xab   : > { %1324 = vmatmul.mubr.bf16.gmra.mrb[28].mxu1 %v1941_v3  ;;  %1364 = vmatprep.mubr.bf16.mxu0 %v1888_v4  ;;  %v2541_v3 = vld [vmem:[%s3175_s3 + $0x18] sm:$0xff]   ;;  %v2542_v4 = vld [vmem:[%s3175_s3 + $0x20] sm:$0xff]  }
  0xac   : > { %1461 = vmatprep.mubr.bf16.mxu1 %v1890_v5  ;;  %v2543_v5 = vld [vmem:[%s3175_s3 + $0x28] sm:$0xff]  }
  0xb2   : > { %1365 = vmatmul.mubr.bf16.vlgmr.msra.gmra.mrb[32].mxu0 %v1887_v10  ;;  %v3088_v10 = vld [vmem:[#allocation4] ss:$0 sm:$0xff] }
  0xb3   : > { %1462 = vmatmul.mubr.bf16.vlgmr.msra.gmra.mrb[32].mxu1 %v1889_v11  ;;  %1372 = vmatprep.mubr.bf16.mxu0 %v1896_v12 }
  0xb4   : > { %1469 = vmatprep.mubr.bf16.mxu1 %v1898_v13  ;;  %2375 = vmatpush3.bf16.msra.mxu0 %v2538_v0 }
  0xb5   : > { %2414 = vmatpush3.bf16.msra.mxu1 %v2538_v0  ;;  %2376 = vmatprep.subr.bf16.mxu0 %v2539_v1 }
  0xb6   : > { %2407 = vmatprep.subr.bf16.mxu1 %v2539_v1 }
  0xb8   : > { %2377 = vmatpush3.bf16.msra.mxu0 %v2539_v1 }
  0xb9   : > { %2415 = vmatpush3.bf16.msra.mxu1 %v2539_v1  ;;  %2378 = vmatprep.subr.bf16.mxu0 %v2540_v2 }
  0xba   : > { %1373 = vmatmul.mubr.bf16.gmra.mrb[36].mxu0 %v1895_v18  ;;  %2408 = vmatprep.subr.bf16.mxu1 %v2540_v2 }
  0xbb   : > { %1470 = vmatmul.mubr.bf16.gmra.mrb[36].mxu1 %v1897_v19  ;;  %1380 = vmatprep.mubr.bf16.mxu0 %v1904_v20 }
  0xbc   : > { %1477 = vmatprep.mubr.bf16.mxu1 %v1906_v21  ;;  %2379 = vmatpush3.bf16.msra.mxu0 %v2540_v2 }
  0xbd   : > { %2416 = vmatpush3.bf16.msra.mxu1 %v2540_v2  ;;  %2380 = vmatprep.subr.bf16.mxu0 %v2541_v3 }
  0xbe   : > { %2409 = vmatprep.subr.bf16.mxu1 %v2541_v3 }
  0xc0   : > { %2381 = vmatpush3.bf16.msra.mxu0 %v2541_v3 }
  0xc1   : > { %2417 = vmatpush3.bf16.msra.mxu1 %v2541_v3  ;;  %2382 = vmatprep.subr.bf16.mxu0 %v2542_v4 }
  0xc2   : > { %1381 = vmatmul.mubr.bf16.gmra.mrb[40].mxu0 %v1903_v26  ;;  %2410 = vmatprep.subr.bf16.mxu1 %v2542_v4 }
  0xc3   : > { %1478 = vmatmul.mubr.bf16.gmra.mrb[40].mxu1 %v1905_v27  ;;  %1388 = vmatprep.mubr.bf16.mxu0 %v1912_v28 }
  0xc4   : > { %1485 = vmatprep.mubr.bf16.mxu1 %v1914_v29  ;;  %2383 = vmatpush3.bf16.msra.mxu0 %v2542_v4 }
  0xc5   : > { %2418 = vmatpush3.bf16.msra.mxu1 %v2542_v4  ;;  %2384 = vmatprep.subr.bf16.mxu0 %v2543_v5 }
  0xc6   : > { %2411 = vmatprep.subr.bf16.mxu1 %v2543_v5 }
  0xc8   : > { %2385 = vmatpush3.bf16.msra.mxu0 %v2543_v5 }
  0xc9   : > { %2419 = vmatpush3.bf16.msra.mxu1 %v2543_v5  ;;  %2386 = vmatprep.subr.bf16.mxu0 %v2544_v6 }
  0xca   : > { %1389 = vmatmul.mubr.bf16.gmra.mrb[44].mxu0 %v1911_v34  ;;  %2412 = vmatprep.subr.bf16.mxu1 %v2544_v6 }
  0xcb   : > { %1486 = vmatmul.mubr.bf16.gmra.mrb[44].mxu1 %v1913_v35  ;;  %1396 = vmatprep.mubr.bf16.mxu0 %v1920_v36 }
  0xcc   : > { %1493 = vmatprep.mubr.bf16.mxu1 %v1922_v37  ;;  %2387 = vmatpush3.bf16.msra.mxu0 %v2544_v6 }
  0xcd   : > { %2420 = vmatpush3.bf16.msra.mxu1 %v2544_v6  ;;  %2388 = vmatprep.subr.bf16.mxu0 %v2545_v7 }
  0xce   : > { %2413 = vmatprep.subr.bf16.mxu1 %v2545_v7 }
  0xd0   : > { %2389 = vmatpush3.bf16.msra.mxu0 %v2545_v7 }
  0xd1   : > { %2421 = vmatpush3.bf16.msra.mxu1 %v2545_v7 }
  0xd2   : > { %1397 = vmatmul.mubr.bf16.gmra.mrb[48].mxu0 %v1919_v42 }
  0xd3   : > { %1494 = vmatmul.mubr.bf16.gmra.mrb[48].mxu1 %v1921_v43  ;;  %1404 = vmatprep.mubr.bf16.mxu0 %v1928_v44 }
  0xd4   : > { %1501 = vmatprep.mubr.bf16.mxu1 %v1930_v45 }
  0xda   : > { %1405 = vmatmul.mubr.bf16.gmra.mrb[52].mxu0 %v1927_v50 }
  0xdb   : > { %1502 = vmatmul.mubr.bf16.gmra.mrb[52].mxu1 %v1929_v51  ;;  %1412 = vmatprep.mubr.bf16.mxu0 %v1936_v52 }
  0xdc   : > { %1509 = vmatprep.mubr.bf16.mxu1 %v1938_v53 }
  0xe2   : > { %1413 = vmatmul.mubr.bf16.gmra.mrb[56].mxu0 %v1935_v58 }
  0xe3   : > { %1510 = vmatmul.mubr.bf16.gmra.mrb[56].mxu1 %v1937_v59  ;;  %1420 = vmatprep.mubr.bf16.mxu0 %v1944_v60 }
  0xe4   : > { %1517 = vmatprep.mubr.bf16.mxu1 %v1946_v61 }
  0xea   : > { %1421 = vmatmul.mubr.bf16.gmra.mrb[60].mxu0 %v1943_v62 }
  0xeb   : > { %1518 = vmatmul.mubr.bf16.gmra.mrb[60].mxu1 %v1945_v63 }
 0x145   : > { %v2118_v8 = vpop.f32.mrb[0].mxu0 }
 0x146   : > { %v2182_v9 = vpop.f32.mrb[0].mxu1  ;;  %v2119_v11 = vpop.f32.mrb[1].mxu0 }
 0x147   : > { %v2120_v12 = vadd.f32 %v2119_v11, %v2118_v8  ;;  %v2183_v13 = vpop.f32.mrb[1].mxu1  ;;  %v2121_v14 = vpop.f32.mrb[2].mxu0 }
 0x148   : > { %v2184_v15 = vadd.f32 %v2183_v13, %v2182_v9  ;;  %v2185_v16 = vpop.f32.mrb[2].mxu1  ;;  %v2122_v17 = vpop.f32.mrb[3].mxu0 }
 0x149   : > { %v1173_v18 = vadd.f32 %v2120_v12, %v3088_v10  ;;  %v2123_v19 = vadd.f32 %v2122_v17, %v2121_v14  ;;  %v2186_v20 = vpop.f32.mrb[3].mxu1 }
 0x14a   : > { %v2187_v21 = vadd.f32 %v2186_v20, %v2185_v16 }
 0x14b   : > { %v3091_v22 = vadd.f32 %v2184_v15, %v1173_v18  ;;  %v1176_v23 = vadd.f32 %v2123_v19, %v3088_v10 }
 0x14d   : > { %v3094_v24 = vadd.f32 %v2187_v21, %v1176_v23  ;;  %v2124_v25 = vpop.f32.mrb[4].mxu0 }
 0x14e   : > { %v2188_v26 = vpop.f32.mrb[4].mxu1  ;;  %v2125_v27 = vpop.f32.mrb[5].mxu0 }
 0x14f   : > { %v2126_v28 = vadd.f32 %v2125_v27, %v2124_v25  ;;  %v2189_v29 = vpop.f32.mrb[5].mxu1  ;;  %v2127_v30 = vpop.f32.mrb[6].mxu0 }
 0x150   : > { %v2190_v31 = vadd.f32 %v2189_v29, %v2188_v26  ;;  %v2191_v32 = vpop.f32.mrb[6].mxu1  ;;  %v2128_v33 = vpop.f32.mrb[7].mxu0 }
 0x151   : > { %v1181_v34 = vadd.f32 %v2126_v28, %v3088_v10  ;;  %v2129_v35 = vadd.f32 %v2128_v33, %v2127_v30  ;;  %v2192_v36 = vpop.f32.mrb[7].mxu1 }
 0x152   : > { %v2193_v37 = vadd.f32 %v2192_v36, %v2191_v32 }
 0x153   : > { %v3097_v38 = vadd.f32 %v2190_v31, %v1181_v34  ;;  %v1184_v39 = vadd.f32 %v2129_v35, %v3088_v10 }
 0x155   : > { %v3100_v40 = vadd.f32 %v2193_v37, %v1184_v39  ;;  %v2130_v41 = vpop.f32.mrb[8].mxu0 }
 0x156   : > { %v2194_v42 = vpop.f32.mrb[8].mxu1  ;;  %v2131_v43 = vpop.f32.mrb[9].mxu0 }
 0x157   : > { %v2132_v44 = vadd.f32 %v2131_v43, %v2130_v41  ;;  %v2195_v45 = vpop.f32.mrb[9].mxu1  ;;  %v2133_v46 = vpop.f32.mrb[10].mxu0 }
 0x158   : > { %v2196_v47 = vadd.f32 %v2195_v45, %v2194_v42  ;;  %v2197_v48 = vpop.f32.mrb[10].mxu1  ;;  %v2134_v49 = vpop.f32.mrb[11].mxu0 }
 0x159   : > { %v1189_v50 = vadd.f32 %v2132_v44, %v3088_v10  ;;  %v2135_v51 = vadd.f32 %v2134_v49, %v2133_v46  ;;  %v2198_v52 = vpop.f32.mrb[11].mxu1 }
 0x15a   : > { %v2199_v53 = vadd.f32 %v2198_v52, %v2197_v48 }
 0x15b   : > { %v3103_v54 = vadd.f32 %v2196_v47, %v1189_v50  ;;  %v1192_v55 = vadd.f32 %v2135_v51, %v3088_v10 }
 0x15d   : > { %v3106_v56 = vadd.f32 %v2199_v53, %v1192_v55  ;;  %v2136_v57 = vpop.f32.mrb[12].mxu0 }
 0x15e   : > { %v2200_v58 = vpop.f32.mrb[12].mxu1  ;;  %v2137_v59 = vpop.f32.mrb[13].mxu0 }
 0x15f   : > { %v2138_v60 = vadd.f32 %v2137_v59, %v2136_v57  ;;  %v2201_v61 = vpop.f32.mrb[13].mxu1  ;;  %v2139_v62 = vpop.f32.mrb[14].mxu0 }
 0x160   : > { %v2202_v63 = vadd.f32 %v2201_v61, %v2200_v58  ;;  %v2203_v0 = vpop.f32.mrb[14].mxu1  ;;  %v2140_v1 = vpop.f32.mrb[15].mxu0 }
 0x161   : > { %v1197_v2 = vadd.f32 %v2138_v60, %v3088_v10  ;;  %v2141_v3 = vadd.f32 %v2140_v1, %v2139_v62  ;;  %v2204_v4 = vpop.f32.mrb[15].mxu1 }
 0x162   : > { %v2205_v5 = vadd.f32 %v2204_v4, %v2203_v0 }
 0x163   : > { %v3109_v6 = vadd.f32 %v2202_v63, %v1197_v2  ;;  %v1200_v7 = vadd.f32 %v2141_v3, %v3088_v10 }
 0x165   : > { %v3112_v8 = vadd.f32 %v2205_v5, %v1200_v7  ;;  %v2142_v9 = vpop.f32.mrb[16].mxu0 }
 0x166   : > { %v2206_v11 = vpop.f32.mrb[16].mxu1  ;;  %v2143_v12 = vpop.f32.mrb[17].mxu0 }
 0x167   : > { %v2144_v13 = vadd.f32 %v2143_v12, %v2142_v9  ;;  %v2207_v14 = vpop.f32.mrb[17].mxu1  ;;  %v2145_v15 = vpop.f32.mrb[18].mxu0 }
 0x168   : > { %v2208_v16 = vadd.f32 %v2207_v14, %v2206_v11  ;;  %v2209_v17 = vpop.f32.mrb[18].mxu1  ;;  %v2146_v18 = vpop.f32.mrb[19].mxu0 }
 0x169   : > { %v1205_v19 = vadd.f32 %v2144_v13, %v3088_v10  ;;  %v2147_v20 = vadd.f32 %v2146_v18, %v2145_v15  ;;  %v2210_v21 = vpop.f32.mrb[19].mxu1 }
 0x16a   : > { %v2211_v23 = vadd.f32 %v2210_v21, %v2209_v17 }
 0x16b   : > { %v3115_v25 = vadd.f32 %v2208_v16, %v1205_v19  ;;  %v1208_v26 = vadd.f32 %v2147_v20, %v3088_v10 }
 0x16d   : > { %v3118_v27 = vadd.f32 %v2211_v23, %v1208_v26  ;;  %v2148_v28 = vpop.f32.mrb[20].mxu0 }
 0x16e   : > { %v2212_v29 = vpop.f32.mrb[20].mxu1  ;;  %v2149_v30 = vpop.f32.mrb[21].mxu0 }
 0x16f   : > { %v2150_v31 = vadd.f32 %v2149_v30, %v2148_v28  ;;  %v2213_v32 = vpop.f32.mrb[21].mxu1  ;;  %v2151_v33 = vpop.f32.mrb[22].mxu0 }
 0x170   : > { %v2214_v34 = vadd.f32 %v2213_v32, %v2212_v29  ;;  %v2215_v35 = vpop.f32.mrb[22].mxu1  ;;  %v2152_v36 = vpop.f32.mrb[23].mxu0 }
 0x171   : > { %v1213_v37 = vadd.f32 %v2150_v31, %v3088_v10  ;;  %v2153_v39 = vadd.f32 %v2152_v36, %v2151_v33  ;;  %v2216_v41 = vpop.f32.mrb[23].mxu1 }
 0x172   : > { %v2217_v42 = vadd.f32 %v2216_v41, %v2215_v35 }
 0x173   : > { %v3121_v43 = vadd.f32 %v2214_v34, %v1213_v37  ;;  %v1216_v44 = vadd.f32 %v2153_v39, %v3088_v10 }
 0x175   : > { %v3124_v45 = vadd.f32 %v2217_v42, %v1216_v44  ;;  %v2154_v46 = vpop.f32.mrb[24].mxu0 }
 0x176   : > { %v2218_v47 = vpop.f32.mrb[24].mxu1  ;;  %v2155_v48 = vpop.f32.mrb[25].mxu0 }
 0x177   : > { %v2156_v49 = vadd.f32 %v2155_v48, %v2154_v46  ;;  %v2219_v50 = vpop.f32.mrb[25].mxu1  ;;  %v2157_v51 = vpop.f32.mrb[26].mxu0 }
 0x178   : > { %v2220_v52 = vadd.f32 %v2219_v50, %v2218_v47  ;;  %v2221_v53 = vpop.f32.mrb[26].mxu1  ;;  %v2158_v55 = vpop.f32.mrb[27].mxu0 }
 0x179   : > { %v1221_v57 = vadd.f32 %v2156_v49, %v3088_v10  ;;  %v2159_v58 = vadd.f32 %v2158_v55, %v2157_v51  ;;  %v2222_v59 = vpop.f32.mrb[27].mxu1 }
 0x17a   : > { %v2223_v60 = vadd.f32 %v2222_v59, %v2221_v53 }
 0x17b   : > { %v3127_v61 = vadd.f32 %v2220_v52, %v1221_v57  ;;  %v1224_v62 = vadd.f32 %v2159_v58, %v3088_v10 }
 0x17d   : > { %v3130_v63 = vadd.f32 %v2223_v60, %v1224_v62  ;;  %v2160_v0 = vpop.f32.mrb[28].mxu0 }
 0x17e   : > { %v2224_v1 = vpop.f32.mrb[28].mxu1  ;;  %v2161_v2 = vpop.f32.mrb[29].mxu0 }
 0x17f   : > { %v2162_v3 = vadd.f32 %v2161_v2, %v2160_v0  ;;  %v2225_v4 = vpop.f32.mrb[29].mxu1  ;;  %v2163_v5 = vpop.f32.mrb[30].mxu0 }
 0x180   : > { %v2226_v7 = vadd.f32 %v2225_v4, %v2224_v1  ;;  %v2227_v9 = vpop.f32.mrb[30].mxu1  ;;  %v2164_v11 = vpop.f32.mrb[31].mxu0 }
 0x181   : > { %v1229_v12 = vadd.f32 %v2162_v3, %v3088_v10  ;;  %v2165_v13 = vadd.f32 %v2164_v11, %v2163_v5  ;;  %v2228_v14 = vpop.f32.mrb[31].mxu1 }
 0x182   : > { %v2229_v15 = vadd.f32 %v2228_v14, %v2227_v9 }
 0x183   : > { %v3133_v16 = vadd.f32 %v2226_v7, %v1229_v12  ;;  %v1232_v17 = vadd.f32 %v2165_v13, %v3088_v10 }
 0x185   : > { %v3136_v18 = vadd.f32 %v2229_v15, %v1232_v17  ;;  %v2246_v19 = vpop.f32.mrb[32].mxu0 }
 0x186   : > { %v2310_v20 = vpop.f32.mrb[32].mxu1  ;;  %v2247_v21 = vpop.f32.mrb[33].mxu0 }
 0x187   : > { %v2248_v23 = vadd.f32 %v2247_v21, %v2246_v19  ;;  %v2311_v26 = vpop.f32.mrb[33].mxu1  ;;  %v2249_v28 = vpop.f32.mrb[34].mxu0 }
 0x188   : > { %v2312_v29 = vadd.f32 %v2311_v26, %v2310_v20  ;;  %v2313_v30 = vpop.f32.mrb[34].mxu1  ;;  %v2250_v31 = vpop.f32.mrb[35].mxu0 }
 0x189   : > { %v1367_v32 = vadd.f32 %v2248_v23, %v3091_v22  ;;  %v2251_v33 = vadd.f32 %v2250_v31, %v2249_v28  ;;  %v2314_v34 = vpop.f32.mrb[35].mxu1 }
 0x18a   : > { %v2315_v35 = vadd.f32 %v2314_v34, %v2313_v30 }
 0x18b   : > { %v1464_v36 = vadd.f32 %v2312_v29, %v1367_v32  ;;  %v1370_v37 = vadd.f32 %v2251_v33, %v3094_v24 }
 0x18d   : > { %v1467_v10 = vadd.f32 %v2315_v35, %v1370_v37  ;;  %v2252_v39 = vpop.f32.mrb[36].mxu0  ;;  %v1526_v44 = vmax.f32 %v1464_v36, 0.0 }
 0x18e   : > { %v2316_v41 = vpop.f32.mrb[36].mxu1  ;;  %v2253_v42 = vpop.f32.mrb[37].mxu0 }
 0x18f   : > { %v1527_v46 = vmax.f32 %v1467_v10, 0.0  ;;  %v2254_v47 = vadd.f32 %v2253_v42, %v2252_v39  ;;  %v2317_v48 = vpop.f32.mrb[37].mxu1  ;;  %v2255_v49 = vpop.f32.mrb[38].mxu0 }
 0x190   : > { %v2318_v50 = vadd.f32 %v2317_v48, %v2316_v41  ;;  %v2319_v51 = vpop.f32.mrb[38].mxu1  ;;  %v2256_v52 = vpop.f32.mrb[39].mxu0 }
 0x191   : > { %v1375_v22 = vadd.f32 %v2254_v47, %v3097_v38  ;;  %v2257_v53 = vadd.f32 %v2256_v52, %v2255_v49  ;;  %v2320_v55 = vpop.f32.mrb[39].mxu1  ;;  %v1542_v57 = vpack.c.bf16 %v1527_v46, %v1526_v44 }
 0x192   : > { %v2321_v58 = vadd.f32 %v2320_v55, %v2319_v51 }
 0x193   : > { %v1472_v59 = vadd.f32 %v2318_v50, %v1375_v22  ;;  %v1378_v24 = vadd.f32 %v2257_v53, %v3100_v40  ;;  %2390 = vmatprep.mubr.bf16.mxu0 %v1542_v57 }
 0x195   : > { %v1475_v60 = vadd.f32 %v2321_v58, %v1378_v24  ;;  %v2258_v62 = vpop.f32.mrb[40].mxu0  ;;  %v1528_v2 = vmax.f32 %v1472_v59, 0.0 }
 0x196   : > { %v2322_v0 = vpop.f32.mrb[40].mxu1  ;;  %v2259_v1 = vpop.f32.mrb[41].mxu0 }
 0x197   : > { %v1529_v3 = vmax.f32 %v1475_v60, 0.0  ;;  %v2260_v4 = vadd.f32 %v2259_v1, %v2258_v62  ;;  %v2323_v5 = vpop.f32.mrb[41].mxu1  ;;  %v2261_v7 = vpop.f32.mrb[42].mxu0 }
 0x198   : > { %v2324_v9 = vadd.f32 %v2323_v5, %v2322_v0  ;;  %v2325_v11 = vpop.f32.mrb[42].mxu1  ;;  %v2262_v38 = vpop.f32.mrb[43].mxu0 }
 0x199   : > { %v1543_v12 = vpack.c.bf16 %v1529_v3, %v1528_v2  ;;  %v1383_v13 = vadd.f32 %v2260_v4, %v3103_v54  ;;  %v2263_v14 = vadd.f32 %v2262_v38, %v2261_v7  ;;  %v2326_v15 = vpop.f32.mrb[43].mxu1 }
 0x19a   : > { %v2327_v17 = vadd.f32 %v2326_v15, %v2325_v11 }
 0x19b   : > { %v1480_v40 = vadd.f32 %v2324_v9, %v1383_v13  ;;  %v1386_v19 = vadd.f32 %v2263_v14, %v3106_v56  ;;  %2391 = vmatmul.mubr.bf16.vlgmr.msra.gmra.mrb[64].mxu0 %v1543_v12 }
 0x19d   : > { %v1483_v20 = vadd.f32 %v2327_v17, %v1386_v19  ;;  %v2264_v21 = vpop.f32.mrb[44].mxu0  ;;  %v1530_v28 = vmax.f32 %v1480_v40, 0.0 }
 0x19e   : > { %v2328_v23 = vpop.f32.mrb[44].mxu1  ;;  %v2265_v26 = vpop.f32.mrb[45].mxu0 }
 0x19f   : > { %v1531_v29 = vmax.f32 %v1483_v20, 0.0  ;;  %v2266_v30 = vadd.f32 %v2265_v26, %v2264_v21  ;;  %v2329_v31 = vpop.f32.mrb[45].mxu1  ;;  %v2267_v32 = vpop.f32.mrb[46].mxu0 }
 0x1a0   : > { %v2330_v33 = vadd.f32 %v2329_v31, %v2328_v23  ;;  %v2331_v34 = vpop.f32.mrb[46].mxu1  ;;  %v2268_v35 = vpop.f32.mrb[47].mxu0 }
 0x1a1   : > { %v1391_v54 = vadd.f32 %v2266_v30, %v3109_v6  ;;  %v2269_v36 = vadd.f32 %v2268_v35, %v2267_v32  ;;  %v2332_v37 = vpop.f32.mrb[47].mxu1  ;;  %v1544_v10 = vpack.c.bf16 %v1531_v29, %v1530_v28 }
 0x1a2   : > { %v2333_v39 = vadd.f32 %v2332_v37, %v2331_v34 }
 0x1a3   : > { %v1488_v56 = vadd.f32 %v2330_v33, %v1391_v54  ;;  %v1394_v41 = vadd.f32 %v2269_v36, %v3112_v8  ;;  %2394 = vmatprep.mubr.bf16.mxu0 %v1544_v10 }
 0x1a5   : > { %v1491_v42 = vadd.f32 %v2333_v39, %v1394_v41  ;;  %v2270_v44 = vpop.f32.mrb[48].mxu0  ;;  %v1532_v48 = vmax.f32 %v1488_v56, 0.0 }
 0x1a6   : > { %v2334_v46 = vpop.f32.mrb[48].mxu1  ;;  %v2271_v47 = vpop.f32.mrb[49].mxu0 }
 0x1a7   : > { %v1533_v49 = vmax.f32 %v1491_v42, 0.0  ;;  %v2272_v50 = vadd.f32 %v2271_v47, %v2270_v44  ;;  %v2335_v51 = vpop.f32.mrb[49].mxu1  ;;  %v2273_v52 = vpop.f32.mrb[50].mxu0 }
 0x1a8   : > { %v2336_v22 = vadd.f32 %v2335_v51, %v2334_v46  ;;  %v2337_v53 = vpop.f32.mrb[50].mxu1  ;;  %v2274_v6 = vpop.f32.mrb[51].mxu0 }
 0x1a9   : > { %v1399_v55 = vadd.f32 %v2272_v50, %v3115_v25  ;;  %v2275_v57 = vadd.f32 %v2274_v6, %v2273_v52  ;;  %v2338_v58 = vpop.f32.mrb[51].mxu1  ;;  %v1545_v59 = vpack.c.bf16 %v1533_v49, %v1532_v48 }
 0x1aa   : > { %v2339_v24 = vadd.f32 %v2338_v58, %v2337_v53 }
 0x1ab   : > { %v1496_v8 = vadd.f32 %v2336_v22, %v1399_v55  ;;  %v1402_v60 = vadd.f32 %v2275_v57, %v3118_v27  ;;  %2395 = vmatmul.mubr.bf16.gmra.mrb[68].mxu0 %v1545_v59 }
 0x1ad   : > { %v1499_v62 = vadd.f32 %v2339_v24, %v1402_v60  ;;  %v2276_v0 = vpop.f32.mrb[52].mxu0  ;;  %v1534_v3 = vmax.f32 %v1496_v8, 0.0 }
 0x1ae   : > { %v2340_v1 = vpop.f32.mrb[52].mxu1  ;;  %v2277_v2 = vpop.f32.mrb[53].mxu0 }
 0x1af   : > { %v1535_v4 = vmax.f32 %v1499_v62, 0.0  ;;  %v2278_v5 = vadd.f32 %v2277_v2, %v2276_v0  ;;  %v2341_v7 = vpop.f32.mrb[53].mxu1  ;;  %v2279_v9 = vpop.f32.mrb[54].mxu0 }
 0x1b0   : > { %v2342_v11 = vadd.f32 %v2341_v7, %v2340_v1  ;;  %v2343_v38 = vpop.f32.mrb[54].mxu1  ;;  %v2280_v25 = vpop.f32.mrb[55].mxu0 }
 0x1b1   : > { %v1407_v12 = vadd.f32 %v2278_v5, %v3121_v43  ;;  %v2281_v13 = vadd.f32 %v2280_v25, %v2279_v9  ;;  %v2344_v14 = vpop.f32.mrb[55].mxu1  ;;  %v1546_v15 = vpack.c.bf16 %v1535_v4, %v1534_v3 }
 0x1b2   : > { %v2345_v17 = vadd.f32 %v2344_v14, %v2343_v38 }
 0x1b3   : > { %v1504_v27 = vadd.f32 %v2342_v11, %v1407_v12  ;;  %v1410_v40 = vadd.f32 %v2281_v13, %v3124_v45  ;;  %2398 = vmatprep.mubr.bf16.mxu1 %v1546_v15 }
 0x1b5   : > { %v1507_v19 = vadd.f32 %v2345_v17, %v1410_v40  ;;  %v2282_v20 = vpop.f32.mrb[56].mxu0  ;;  %v1536_v26 = vmax.f32 %v1504_v27, 0.0 }
 0x1b6   : > { %v2346_v21 = vpop.f32.mrb[56].mxu1  ;;  %v2283_v23 = vpop.f32.mrb[57].mxu0 }
 0x1b7   : > { %v1537_v28 = vmax.f32 %v1507_v19, 0.0  ;;  %v2284_v29 = vadd.f32 %v2283_v23, %v2282_v20  ;;  %v2347_v30 = vpop.f32.mrb[57].mxu1  ;;  %v2285_v31 = vpop.f32.mrb[58].mxu0 }
 0x1b8   : > { %v2348_v32 = vadd.f32 %v2347_v30, %v2346_v21  ;;  %v2349_v33 = vpop.f32.mrb[58].mxu1  ;;  %v2286_v43 = vpop.f32.mrb[59].mxu0 }
 0x1b9   : > { %v1547_v34 = vpack.c.bf16 %v1537_v28, %v1536_v26  ;;  %v1415_v35 = vadd.f32 %v2284_v29, %v3127_v61  ;;  %v2287_v54 = vadd.f32 %v2286_v43, %v2285_v31  ;;  %v2350_v36 = vpop.f32.mrb[59].mxu1 }
 0x1ba   : > { %v2351_v37 = vadd.f32 %v2350_v36, %v2349_v33 }
 0x1bb   : > { %v1512_v45 = vadd.f32 %v2348_v32, %v1415_v35  ;;  %v1418_v10 = vadd.f32 %v2287_v54, %v3130_v63  ;;  %2399 = vmatmul.mubr.bf16.vlgmr.msra.gmra.mrb[64].mxu1 %v1547_v34 }
 0x1bd   : > { %v1515_v39 = vadd.f32 %v2351_v37, %v1418_v10  ;;  %v2288_v56 = vpop.f32.mrb[60].mxu0  ;;  %v1538_v44 = vmax.f32 %v1512_v45, 0.0 }
 0x1be   : > { %v2352_v41 = vpop.f32.mrb[60].mxu1  ;;  %v2289_v42 = vpop.f32.mrb[61].mxu0 }
 0x1bf   : > { %v1539_v46 = vmax.f32 %v1515_v39, 0.0  ;;  %v2290_v47 = vadd.f32 %v2289_v42, %v2288_v56  ;;  %v2353_v48 = vpop.f32.mrb[61].mxu1  ;;  %v2291_v49 = vpop.f32.mrb[62].mxu0 }
 0x1c0   : > { %v2354_v50 = vadd.f32 %v2353_v48, %v2352_v41  ;;  %v2355_v51 = vpop.f32.mrb[62].mxu1  ;;  %v2292_v61 = vpop.f32.mrb[63].mxu0 }
 0x1c1   : > { %v1423_v52 = vadd.f32 %v2290_v47, %v3133_v16  ;;  %v2293_v22 = vadd.f32 %v2292_v61, %v2291_v49  ;;  %v2356_v53 = vpop.f32.mrb[63].mxu1  ;;  %v1548_v6 = vpack.c.bf16 %v1539_v46, %v1538_v44 }
 0x1c2   : > { %v2357_v63 = vadd.f32 %v2356_v53, %v2355_v51 }
 0x1c3   : > { %v1520_v55 = vadd.f32 %v2354_v50, %v1423_v52  ;;  %v1426_v57 = vadd.f32 %v2293_v22, %v3136_v18  ;;  %2402 = vmatprep.mubr.bf16.mxu1 %v1548_v6 }
 0x1c5   : > { %v1523_v58 = vadd.f32 %v2357_v63, %v1426_v57  ;;  %v1540_v59 = vmax.f32 %v1520_v55, 0.0 }
 0x1c7   : > { %v1541_v24 = vmax.f32 %v1523_v58, 0.0 }
 0x1c9   : > { %v1549_v8 = vpack.c.bf16 %v1541_v24, %v1540_v59 }
 0x1cb   : > { %2403 = vmatmul.mubr.bf16.gmra.mrb[68].mxu1 %v1549_v8 }
 0x26e   : > { %v2392_v60 = vpop.f32.mrb[64].mxu0 }
 0x26f   : > { %v1648_v16 = vpop.f32.mrb[65].mxu0 }
 0x270   : > { %v2393_v62 = vpop.f32.mrb[66].mxu0 }
 0x271   : > { %v2063_v0 = vpack.c.bf16 %v2393_v62, %v2392_v60  ;;  %v1651_v18 = vpop.f32.mrb[67].mxu0 }
 0x272   : > { %v2058_v1 = vpack.c.bf16 %v1651_v18, %v1648_v16 }
 0x273   : > { %2095 = vst [vmem:[%s232_s8 + $0x8] sm:$0xff] %v2063_v0  }
 0x274   : > { %2059 = vst [vmem:[%s232_s8] sm:$0xff] %v2058_v1  }
 0x27e   : > { %v2396_v2 = vpop.f32.mrb[68].mxu0 }
 0x27f   : > { %v1664_v3 = vpop.f32.mrb[69].mxu0 }
 0x280   : > { %v2397_v4 = vpop.f32.mrb[70].mxu0 }
 0x281   : > { %v2073_v5 = vpack.c.bf16 %v2397_v4, %v2396_v2  ;;  %v1667_v7 = vpop.f32.mrb[71].mxu0 }
 0x282   : > { %v2068_v9 = vpack.c.bf16 %v1667_v7, %v1664_v3 }
 0x283   : > { %2097 = vst [vmem:[%s232_s8 + $0x18] sm:$0xff] %v2073_v5  }
 0x284   : > { %2096 = vst [vmem:[%s232_s8 + $0x10] sm:$0xff] %v2068_v9  }
 0x28e   : > { %v2400_v11 = vpop.f32.mrb[64].mxu1 }
 0x28f   : > { %v1680_v38 = vpop.f32.mrb[65].mxu1 }
 0x290   : > { %v2401_v25 = vpop.f32.mrb[66].mxu1 }
 0x291   : > { %v2083_v12 = vpack.c.bf16 %v2401_v25, %v2400_v11  ;;  %v1683_v13 = vpop.f32.mrb[67].mxu1 }
 0x292   : > { %v2078_v14 = vpack.c.bf16 %v1683_v13, %v1680_v38 }
 0x293   : > { %2099 = vst [vmem:[%s232_s8 + $0x28] sm:$0xff] %v2083_v12  }
 0x294   : > { %2098 = vst [vmem:[%s232_s8 + $0x20] sm:$0xff] %v2078_v14  }
 0x29e   : > { %v2404_v15 = vpop.f32.mrb[68].mxu1 }
 0x29f   : > { %v1696_v17 = vpop.f32.mrb[69].mxu1 }
 0x2a0   : > { %v2405_v27 = vpop.f32.mrb[70].mxu1 }
 0x2a1   : > { %v2093_v40 = vpack.c.bf16 %v2405_v27, %v2404_v15  ;;  %v1699_v19 = vpop.f32.mrb[71].mxu1 }
 0x2a2   : > { %v2088_v20 = vpack.c.bf16 %v1699_v19, %v1696_v17 }
 0x2a3   : > { %2101 = vst [vmem:[%s232_s8 + $0x38] sm:$0xff] %v2093_v40  }
 0x2a4   : > { %2100 = vst [vmem:[%s232_s8 + $0x30] sm:$0xff] %v2088_v20  }
 0x2a5 PF: > { %p15_p3 = scmp.ge.s32.totalorder %s2693_s20, 10   ;;  %s3192_s15 = smov %s2634_s16 }
 0x2a6   : > { %s3193_s16 = smov %s2638_s17  ;;  %s3194_s17 = smov %s2703_s23 }
 0x2a7   : > { %s3195_s18 = smov %s2693_s20  ;;  %17 = sbr.rel (!%p15_p3) target bundleno = 4 (0x4), region = 80 }
 0x2ae   :  { %1813 = vsyncpa [#allocation3], 1 }
 0x2af   :  { %1815 = vsyncpa [#allocation3 + $0x1], 1 }
 0x2b0   :  { %1816 = vsyncpa [#allocation5], 1 }

</bundles_post_ra>
